<compile_context>
chip_gen: v5e
topology: v5e:2x2
jax: 0.10.0
libtpu: 0.0.40
codegen_flags: <defaults>
</compile_context>

<pallas_src>
import numpy as np

import jax
import jax.numpy as jnp
from jax import lax
from jax.experimental import pallas as pl
from jax.experimental.pallas import tpu as pltpu

# Set to jnp.bfloat16 on v6e/v7x for ~2x MXU throughput (accumulation stays f32).
MXU_DTYPE = jnp.float32


def _round_up(x, m):
    return ((x + m - 1) // m) * m


# ------------------------------ fused kernel ---------------------------------

def _make_fused_kernel(H, W, CP, B_tile, num_conv_layers, num_fc_layers):
    HW = H * W
    LANES = B_tile * HW
    # tap order k = (oy+1)*3 + (ox+1); lane shift within a sample = oy*W + ox
    shifts = [oy * W + ox for oy in (-1, 0, 1) for ox in (-1, 0, 1)]

    def kernel(*refs):
        # refs = (x, masks, conv_w, conv_b, fc_w_0, fc_b_0, ..., out,
        #         patches_scratch, feats_scratch)
        x_ref, m_ref, wc_ref, bc_ref = refs[:4]
        fc_refs = refs[4:4 + 2 * num_fc_layers]
        o_ref = refs[4 + 2 * num_fc_layers]
        patches_ref, feats_ref = refs[-2:]

        # ---- conv stack.  act: (CP, B_tile*HW), lane index = b*HW + h*W + w.
        act = x_ref[...]
        for l in range(num_conv_layers):
            for k, s in enumerate(shifts):
                shifted = act if s == 0 else pltpu.roll(act, (-s) % LANES, axis=1)
                # mask zeroes every out-of-image lane (and therefore every lane
                # the circular roll could have wrapped across a sample border).
                patches_ref[k * CP:(k + 1) * CP, :] = shifted * m_ref[k]
            y = jnp.dot(wc_ref[l].astype(MXU_DTYPE),
                        patches_ref[...].astype(MXU_DTYPE),
                        preferred_element_type=jnp.float32)
            act = jnp.tanh(y + bc_ref[l])

        # ---- conv -> fc handoff (PyTorch NCHW flatten): feats[b, c*HW + p]
        for b in range(B_tile):
            for c in range(CP):
                feats_ref[b:b + 1, c * HW:(c + 1) * HW] = \
                    act[c:c + 1, b * HW:(b + 1) * HW]

        # ---- fc stack: plain dots against pre-packed (In, Out) weights.
        h = feats_ref[...]
        for i in range(num_fc_layers):
            w_ref, b_ref = fc_refs[2 * i], fc_refs[2 * i + 1]
            h = jnp.dot(h.astype(MXU_DTYPE), w_ref[...].astype(MXU_DTYPE),
                        preferred_element_type=jnp.float32) + b_ref[...]
            if i != num_fc_layers - 1:
                h = jnp.tanh(h)
        o_ref[...] = h.astype(o_ref.dtype)

    return kernel


def _tap_masks(H, W, B_tile):
    """(9, 1, B_tile*H*W) 0/1 masks for a 3x3 / stride-1 / pad-1 conv, tiled
    per sample so lane rolls can never leak across sample boundaries."""
    HW = H * W
    hh, ww = np.divmod(np.arange(HW), W)
    masks = np.zeros((9, 1, HW), np.float32)
    k = 0
    for oy in (-1, 0, 1):
        for ox in (-1, 0, 1):
            ok = ((hh + oy >= 0) & (hh + oy < H) &
                  (ww + ox >= 0) & (ww + ox < W))
            masks[k, 0, :] = ok.astype(np.float32)
            k += 1
    return np.tile(masks, (1, 1, B_tile))


# --------------------------- one-time param repack ----------------------------

def prepare_params(params, input_size):
    """One-time repack of PyTorch-layout params into kernel layouts."""
    Cin, H, W = input_size
    HW = H * W
    conv, fc = params["conv"], params["fc"]
    channels = [Cin] + [int(w.shape[0]) for (w, _) in conv]
    CP = _round_up(max(channels), 8)          # uniform channel pad (sublanes)

    wc, bc, cin = [], [], Cin
    for (w, b) in conv:
        cout = int(w.shape[0])
        wt = jnp.transpose(w, (2, 3, 1, 0))                   # (3,3,Cin,Cout)
        wt = jnp.pad(wt, ((0, 0), (0, 0), (0, CP - cin), (0, CP - cout)))
        wc.append(wt.reshape(9 * CP, CP).T)                   # (CP, 9*CP)
        bc.append(jnp.pad(b, (0, CP - cout)).reshape(CP, 1))  # (CP, 1)
        cin = cout
    conv_w = jnp.stack(wc)                                     # (L, CP, 9*CP)
    conv_b = jnp.stack(bc)                                     # (L, CP, 1)

    c_last = int(conv[-1][0].shape[0])
    fc_packed = []
    for i, (w, b) in enumerate(fc):
        if i == 0:
            # (Out, C*HW) -> (CP*HW, Out); padded-channel rows are zero so the
            # kernel's channel-padded feature layout contracts directly.
            out_s = int(w.shape[0])
            wt = w.reshape(out_s, c_last, HW)
            wt = jnp.pad(wt, ((0, 0), (0, CP - c_last), (0, 0)))
            wt = wt.reshape(out_s, CP * HW).T                 # (CP*HW, Out)
        else:
            wt = w.T                                          # (In, Out)
        fc_packed += [wt, b.reshape(1, -1)]

    return {"conv_w": conv_w, "conv_b": conv_b, "fc": tuple(fc_packed)}


# ------------------------------ forward wrapper -------------------------------

def conv_network_forward(x_nchw, packed):
    """Fused Pallas forward of ConvNetwork (activation='tanh')."""
    N, Cin, H, W = x_nchw.shape
    HW = H * W
    num_conv_layers, CP = packed["conv_w"].shape[0], packed["conv_w"].shape[1]
    num_fc_layers = len(packed["fc"]) // 2
    out_size = packed["fc"][-1].shape[-1]

    # Fold the batch into the lane axis; only grow the grid for large batches.
    if HW % 128 == 0:
        B_tile = max(1, min(N, 2048 // HW))
    else:
        B_tile = N          # single tile => block == full array, no (*,128) rule
    N_pad = _round_up(N, B_tile)
    grid = (N_pad // B_tile,)

    # (N, Cin, H, W) -> (CP, N_pad*HW), lane index = b*HW + h*W + w
    x = x_nchw.reshape(N, Cin, HW)
    x = jnp.pad(x, ((0, N_pad - N), (0, CP - Cin), (0, 0)))
    x = jnp.transpose(x, (1, 0, 2)).reshape(CP, N_pad * HW)

    masks = jnp.asarray(_tap_masks(H, W, B_tile))              # (9,1,B_tile*HW)

    kernel = _make_fused_kernel(H, W, CP, B_tile, num_conv_layers, num_fc_layers)

    in_specs = [
        pl.BlockSpec((CP, B_tile * HW), lambda g: (0, g)),
        pl.BlockSpec((9, 1, B_tile * HW), lambda g: (0, 0, 0)),
        pl.BlockSpec(tuple(packed["conv_w"].shape), lambda g: (0, 0, 0)),
        pl.BlockSpec(tuple(packed["conv_b"].shape), lambda g: (0, 0, 0)),
    ]
    for i in range(num_fc_layers):
        w, b = packed["fc"][2 * i], packed["fc"][2 * i + 1]
        in_specs += [pl.BlockSpec(tuple(w.shape), lambda g: (0, 0)),
                     pl.BlockSpec(tuple(b.shape), lambda g: (0, 0))]

    out = pl.pallas_call(
        kernel,
        out_shape=jax.ShapeDtypeStruct((N_pad, out_size), x_nchw.dtype),
        grid=grid,
        in_specs=in_specs,
        out_specs=pl.BlockSpec((B_tile, out_size), lambda g: (g, 0)),
        scratch_shapes=[pltpu.VMEM((9 * CP, B_tile * HW), jnp.float32),
                        pltpu.VMEM((B_tile, CP * HW), jnp.float32)],
        compiler_params=pltpu.CompilerParams(
            dimension_semantics=("parallel",)),
    )(x, masks, packed["conv_w"], packed["conv_b"], *packed["fc"])
    return out[:N]


# -------------------------- reference & param init ----------------------------

def _reference_forward(x, params):
    """Pure-JAX reference (lax.conv + matmuls) matching the PyTorch module."""
    y = x
    for (w, b) in params["conv"]:
        y = lax.conv_general_dilated(y, w, (1, 1), ((1, 1), (1, 1)),
                                     dimension_numbers=("NCHW", "OIHW", "NCHW"))
        y = jnp.tanh(y + b.reshape(1, -1, 1, 1))
    h = y.reshape(y.shape[0], -1)
    for i, (w, b) in enumerate(params["fc"]):
        h = h @ w.T + b
        if i != len(params["fc"]) - 1:
            h = jnp.tanh(h)
    return h


def init_params(key, input_size, num_conv_layers, initial_channels,
                num_fc_layers, fc_hidden_size, output_size):
    cin0, H, W = input_size
    conv_params, in_c, out_c = [], cin0, initial_channels
    for _ in range(num_conv_layers):
        key, k1, k2 = jax.random.split(key, 3)
        bound = 1.0 / float(in_c * 9) ** 0.5
        w = jax.random.uniform(k1, (out_c, in_c, 3, 3), jnp.float32, -bound, bound)
        b = jax.random.uniform(k2, (out_c,), jnp.float32, -bound, bound)
        conv_params.append((w, b))
        in_c = out_c

    feature_size = H * W * initial_channels
    fc_params = []
    for i in range(num_fc_layers):
        in_s = feature_size if i == 0 else fc_hidden_size
        out_s = output_size if i == num_fc_layers - 1 else fc_hidden_size
        key, k1, k2 = jax.random.split(key, 3)
        bound = 1.0 / float(in_s) ** 0.5
        w = jax.random.uniform(k1, (out_s, in_s), jnp.float32, -bound, bound)
        b = jax.random.uniform(k2, (out_s,), jnp.float32, -bound, bound)
        fc_params.append((w, b))
    return {"conv": conv_params, "fc": fc_params}


# ----------------------------------- main -------------------------------------

if __name__ == "__main__":
    # ConvNetwork(input_size=(4,16,16), num_conv_layers=2, initial_channels=8,
    #             num_fc_layers=2, fc_hidden_size=32, output_size=10,
    #             activation='tanh')
    input_size = (4, 16, 16)
    num_conv_layers = 2
    initial_channels = 8
    num_fc_layers = 2
    fc_hidden_size = 32
    output_size = 10
    batch = 2

    root = jax.random.PRNGKey(0)
    kx, kp = jax.random.split(root)
    x = jax.random.normal(kx, (batch,) + input_size, jnp.float32)      # NCHW
    params = init_params(kp, input_size, num_conv_layers, initial_channels,
                         num_fc_layers, fc_hidden_size, output_size)
    packed = prepare_params(params, input_size)     # one-time weight repack

    fwd = jax.jit(conv_network_forward)
    out = jax.block_until_ready(fwd(x, packed))
    assert out.shape == (batch, output_size), out.shape

    # numerical check against the pure-JAX reference
    ref = _reference_forward(x, params)
    err = float(jnp.max(jnp.abs(out - ref)))
    assert err < 2e-2, f"max abs error {err}"
    print("KERNEL_OK")
</pallas_src>

<mosaic_0001>
module attributes {stable_mosaic.version = 11 : i64} {
  func.func @kernel(%arg0: i32, %arg1: memref<8x512xf32, #tpu.memory_space<vmem>>, %arg2: memref<9x1x512xf32, #tpu.memory_space<vmem>>, %arg3: memref<2x8x72xf32, #tpu.memory_space<vmem>>, %arg4: memref<2x8x1xf32, #tpu.memory_space<vmem>>, %arg5: memref<2048x32xf32, #tpu.memory_space<vmem>>, %arg6: memref<1x32xf32, #tpu.memory_space<vmem>>, %arg7: memref<32x10xf32, #tpu.memory_space<vmem>>, %arg8: memref<1x10xf32, #tpu.memory_space<vmem>>, %arg9: memref<2x10xf32, #tpu.memory_space<vmem>>, %arg10: memref<72x512xf32, #tpu.memory_space<vmem>>, %arg11: memref<2x2048xf32, #tpu.memory_space<vmem>>) attributes {dimension_semantics = [#tpu.dimension_semantics<parallel>], iteration_bounds = array<i64: 1>, scalar_prefetch = 0 : i64, scratch_operands = 2 : i64, tpu.core_type = #tpu.core_type<tc>, window_params = [{transform_indices = @transform_0, window_bounds = array<i64: 8, 512>}, {pipeline_mode = #tpu.pipeline_mode<synchronous>, transform_indices = @transform_1, window_bounds = array<i64: 9, 1, 512>}, {pipeline_mode = #tpu.pipeline_mode<synchronous>, transform_indices = @transform_2, window_bounds = array<i64: 2, 8, 72>}, {pipeline_mode = #tpu.pipeline_mode<synchronous>, transform_indices = @transform_3, window_bounds = array<i64: 2, 8, 1>}, {pipeline_mode = #tpu.pipeline_mode<synchronous>, transform_indices = @transform_4, window_bounds = array<i64: 2048, 32>}, {pipeline_mode = #tpu.pipeline_mode<synchronous>, transform_indices = @transform_5, window_bounds = array<i64: 1, 32>}, {pipeline_mode = #tpu.pipeline_mode<synchronous>, transform_indices = @transform_6, window_bounds = array<i64: 32, 10>}, {pipeline_mode = #tpu.pipeline_mode<synchronous>, transform_indices = @transform_7, window_bounds = array<i64: 1, 10>}, {transform_indices = @transform_8, window_bounds = array<i64: 2, 10>}]} {
    %c0 = arith.constant 0 : index
    %c0_0 = arith.constant 0 : index
    %0 = vector.load %arg1[%c0, %c0_0] : memref<8x512xf32, #tpu.memory_space<vmem>>, vector<8x512xf32>
    %c17_i32 = arith.constant 17 : i32
    %1 = tpu.dynamic_rotate %0 by %c17_i32 dim 1 : vector<8x512xf32>, i32 -> vector<8x512xf32>
    %c0_1 = arith.constant 0 : index
    %c0_2 = arith.constant 0 : index
    %c0_3 = arith.constant 0 : index
    %2 = vector.load %arg2[%c0_1, %c0_2, %c0_3] : memref<9x1x512xf32, #tpu.memory_space<vmem>>, vector<1x1x512xf32>
    %3 = vector.shape_cast %2 : vector<1x1x512xf32> to vector<1x512xf32>
    %4 = vector.broadcast %3 : vector<1x512xf32> to vector<8x512xf32>
    %5 = arith.mulf %1, %4 : vector<8x512xf32>
    %c0_4 = arith.constant 0 : index
    %c0_5 = arith.constant 0 : index
    %6 = vector.load %arg10[%c0_4, %c0_5] : memref<72x512xf32, #tpu.memory_space<vmem>>, vector<8x512xf32>
    tpu.vector_store %arg10[%c0_4, %c0_5], %5 {strides = array<i32>} : memref<72x512xf32, #tpu.memory_space<vmem>>, vector<8x512xf32>,
    %c16_i32 = arith.constant 16 : i32
    %7 = tpu.dynamic_rotate %0 by %c16_i32 dim 1 : vector<8x512xf32>, i32 -> vector<8x512xf32>
    %c1 = arith.constant 1 : index
    %c0_6 = arith.constant 0 : index
    %c0_7 = arith.constant 0 : index
    %8 = vector.load %arg2[%c1, %c0_6, %c0_7] : memref<9x1x512xf32, #tpu.memory_space<vmem>>, vector<1x1x512xf32>
    %9 = vector.shape_cast %8 : vector<1x1x512xf32> to vector<1x512xf32>
    %10 = vector.broadcast %9 : vector<1x512xf32> to vector<8x512xf32>
    %11 = arith.mulf %7, %10 : vector<8x512xf32>
    %c8 = arith.constant 8 : index
    %c0_8 = arith.constant 0 : index
    %12 = vector.load %arg10[%c8, %c0_8] : memref<72x512xf32, #tpu.memory_space<vmem>>, vector<8x512xf32>
    tpu.vector_store %arg10[%c8, %c0_8], %11 {strides = array<i32>} : memref<72x512xf32, #tpu.memory_space<vmem>>, vector<8x512xf32>,
    %c15_i32 = arith.constant 15 : i32
    %13 = tpu.dynamic_rotate %0 by %c15_i32 dim 1 : vector<8x512xf32>, i32 -> vector<8x512xf32>
    %c2 = arith.constant 2 : index
    %c0_9 = arith.constant 0 : index
    %c0_10 = arith.constant 0 : index
    %14 = vector.load %arg2[%c2, %c0_9, %c0_10] : memref<9x1x512xf32, #tpu.memory_space<vmem>>, vector<1x1x512xf32>
    %15 = vector.shape_cast %14 : vector<1x1x512xf32> to vector<1x512xf32>
    %16 = vector.broadcast %15 : vector<1x512xf32> to vector<8x512xf32>
    %17 = arith.mulf %13, %16 : vector<8x512xf32>
    %c16 = arith.constant 16 : index
    %c0_11 = arith.constant 0 : index
    %18 = vector.load %arg10[%c16, %c0_11] : memref<72x512xf32, #tpu.memory_space<vmem>>, vector<8x512xf32>
    tpu.vector_store %arg10[%c16, %c0_11], %17 {strides = array<i32>} : memref<72x512xf32, #tpu.memory_space<vmem>>, vector<8x512xf32>,
    %c1_i32 = arith.constant 1 : i32
    %19 = tpu.dynamic_rotate %0 by %c1_i32 dim 1 : vector<8x512xf32>, i32 -> vector<8x512xf32>
    %c3 = arith.constant 3 : index
    %c0_12 = arith.constant 0 : index
    %c0_13 = arith.constant 0 : index
    %20 = vector.load %arg2[%c3, %c0_12, %c0_13] : memref<9x1x512xf32, #tpu.memory_space<vmem>>, vector<1x1x512xf32>
    %21 = vector.shape_cast %20 : vector<1x1x512xf32> to vector<1x512xf32>
    %22 = vector.broadcast %21 : vector<1x512xf32> to vector<8x512xf32>
    %23 = arith.mulf %19, %22 : vector<8x512xf32>
    %c24 = arith.constant 24 : index
    %c0_14 = arith.constant 0 : index
    %24 = vector.load %arg10[%c24, %c0_14] : memref<72x512xf32, #tpu.memory_space<vmem>>, vector<8x512xf32>
    tpu.vector_store %arg10[%c24, %c0_14], %23 {strides = array<i32>} : memref<72x512xf32, #tpu.memory_space<vmem>>, vector<8x512xf32>,
    %c4 = arith.constant 4 : index
    %c0_15 = arith.constant 0 : index
    %c0_16 = arith.constant 0 : index
    %25 = vector.load %arg2[%c4, %c0_15, %c0_16] : memref<9x1x512xf32, #tpu.memory_space<vmem>>, vector<1x1x512xf32>
    %26 = vector.shape_cast %25 : vector<1x1x512xf32> to vector<1x512xf32>
    %27 = vector.broadcast %26 : vector<1x512xf32> to vector<8x512xf32>
    %28 = arith.mulf %0, %27 : vector<8x512xf32>
    %c32 = arith.constant 32 : index
    %c0_17 = arith.constant 0 : index
    %29 = vector.load %arg10[%c32, %c0_17] : memref<72x512xf32, #tpu.memory_space<vmem>>, vector<8x512xf32>
    tpu.vector_store %arg10[%c32, %c0_17], %28 {strides = array<i32>} : memref<72x512xf32, #tpu.memory_space<vmem>>, vector<8x512xf32>,
    %c511_i32 = arith.constant 511 : i32
    %30 = tpu.dynamic_rotate %0 by %c511_i32 dim 1 : vector<8x512xf32>, i32 -> vector<8x512xf32>
    %c5 = arith.constant 5 : index
    %c0_18 = arith.constant 0 : index
    %c0_19 = arith.constant 0 : index
    %31 = vector.load %arg2[%c5, %c0_18, %c0_19] : memref<9x1x512xf32, #tpu.memory_space<vmem>>, vector<1x1x512xf32>
    %32 = vector.shape_cast %31 : vector<1x1x512xf32> to vector<1x512xf32>
    %33 = vector.broadcast %32 : vector<1x512xf32> to vector<8x512xf32>
    %34 = arith.mulf %30, %33 : vector<8x512xf32>
    %c40 = arith.constant 40 : index
    %c0_20 = arith.constant 0 : index
    %35 = vector.load %arg10[%c40, %c0_20] : memref<72x512xf32, #tpu.memory_space<vmem>>, vector<8x512xf32>
    tpu.vector_store %arg10[%c40, %c0_20], %34 {strides = array<i32>} : memref<72x512xf32, #tpu.memory_space<vmem>>, vector<8x512xf32>,
    %c497_i32 = arith.constant 497 : i32
    %36 = tpu.dynamic_rotate %0 by %c497_i32 dim 1 : vector<8x512xf32>, i32 -> vector<8x512xf32>
    %c6 = arith.constant 6 : index
    %c0_21 = arith.constant 0 : index
    %c0_22 = arith.constant 0 : index
    %37 = vector.load %arg2[%c6, %c0_21, %c0_22] : memref<9x1x512xf32, #tpu.memory_space<vmem>>, vector<1x1x512xf32>
    %38 = vector.shape_cast %37 : vector<1x1x512xf32> to vector<1x512xf32>
    %39 = vector.broadcast %38 : vector<1x512xf32> to vector<8x512xf32>
    %40 = arith.mulf %36, %39 : vector<8x512xf32>
    %c48 = arith.constant 48 : index
    %c0_23 = arith.constant 0 : index
    %41 = vector.load %arg10[%c48, %c0_23] : memref<72x512xf32, #tpu.memory_space<vmem>>, vector<8x512xf32>
    tpu.vector_store %arg10[%c48, %c0_23], %40 {strides = array<i32>} : memref<72x512xf32, #tpu.memory_space<vmem>>, vector<8x512xf32>,
    %c496_i32 = arith.constant 496 : i32
    %42 = tpu.dynamic_rotate %0 by %c496_i32 dim 1 : vector<8x512xf32>, i32 -> vector<8x512xf32>
    %c7 = arith.constant 7 : index
    %c0_24 = arith.constant 0 : index
    %c0_25 = arith.constant 0 : index
    %43 = vector.load %arg2[%c7, %c0_24, %c0_25] : memref<9x1x512xf32, #tpu.memory_space<vmem>>, vector<1x1x512xf32>
    %44 = vector.shape_cast %43 : vector<1x1x512xf32> to vector<1x512xf32>
    %45 = vector.broadcast %44 : vector<1x512xf32> to vector<8x512xf32>
    %46 = arith.mulf %42, %45 : vector<8x512xf32>
    %c56 = arith.constant 56 : index
    %c0_26 = arith.constant 0 : index
    %47 = vector.load %arg10[%c56, %c0_26] : memref<72x512xf32, #tpu.memory_space<vmem>>, vector<8x512xf32>
    tpu.vector_store %arg10[%c56, %c0_26], %46 {strides = array<i32>} : memref<72x512xf32, #tpu.memory_space<vmem>>, vector<8x512xf32>,
    %c495_i32 = arith.constant 495 : i32
    %48 = tpu.dynamic_rotate %0 by %c495_i32 dim 1 : vector<8x512xf32>, i32 -> vector<8x512xf32>
    %c8_27 = arith.constant 8 : index
    %c0_28 = arith.constant 0 : index
    %c0_29 = arith.constant 0 : index
    %49 = vector.load %arg2[%c8_27, %c0_28, %c0_29] : memref<9x1x512xf32, #tpu.memory_space<vmem>>, vector<1x1x512xf32>
    %50 = vector.shape_cast %49 : vector<1x1x512xf32> to vector<1x512xf32>
    %51 = vector.broadcast %50 : vector<1x512xf32> to vector<8x512xf32>
    %52 = arith.mulf %48, %51 : vector<8x512xf32>
    %c64 = arith.constant 64 : index
    %c0_30 = arith.constant 0 : index
    %53 = vector.load %arg10[%c64, %c0_30] : memref<72x512xf32, #tpu.memory_space<vmem>>, vector<8x512xf32>
    tpu.vector_store %arg10[%c64, %c0_30], %52 {strides = array<i32>} : memref<72x512xf32, #tpu.memory_space<vmem>>, vector<8x512xf32>,
    %c0_31 = arith.constant 0 : index
    %c0_32 = arith.constant 0 : index
    %c0_33 = arith.constant 0 : index
    %54 = vector.load %arg3[%c0_31, %c0_32, %c0_33] : memref<2x8x72xf32, #tpu.memory_space<vmem>>, vector<1x8x72xf32>
    %55 = vector.shape_cast %54 : vector<1x8x72xf32> to vector<8x72xf32>
    %c0_34 = arith.constant 0 : index
    %c0_35 = arith.constant 0 : index
    %56 = vector.load %arg10[%c0_34, %c0_35] : memref<72x512xf32, #tpu.memory_space<vmem>>, vector<72x512xf32>
    %cst = arith.constant dense<0.000000e+00> : vector<8x512xf32>
    %57 = tpu.matmul %55, %56, %cst {dimension_numbers = #tpu.dot_dimension_numbers<[1], [0], [0], [1], [0, 0, 1, 1], [], []>} : vector<8x72xf32>, vector<72x512xf32>, vector<8x512xf32> -> vector<8x512xf32>
    %c0_36 = arith.constant 0 : index
    %c0_37 = arith.constant 0 : index
    %c0_38 = arith.constant 0 : index
    %58 = vector.load %arg4[%c0_36, %c0_37, %c0_38] : memref<2x8x1xf32, #tpu.memory_space<vmem>>, vector<1x8x1xf32>
    %59 = vector.shape_cast %58 : vector<1x8x1xf32> to vector<8x1xf32>
    %60 = vector.broadcast %59 : vector<8x1xf32> to vector<8x512xf32>
    %61 = arith.addf %57, %60 : vector<8x512xf32>
    %62 = math.tanh %61 : vector<8x512xf32>
    %c17_i32_39 = arith.constant 17 : i32
    %63 = tpu.dynamic_rotate %62 by %c17_i32_39 dim 1 : vector<8x512xf32>, i32 -> vector<8x512xf32>
    %c0_40 = arith.constant 0 : index
    %c0_41 = arith.constant 0 : index
    %c0_42 = arith.constant 0 : index
    %64 = vector.load %arg2[%c0_40, %c0_41, %c0_42] : memref<9x1x512xf32, #tpu.memory_space<vmem>>, vector<1x1x512xf32>
    %65 = vector.shape_cast %64 : vector<1x1x512xf32> to vector<1x512xf32>
    %66 = vector.broadcast %65 : vector<1x512xf32> to vector<8x512xf32>
    %67 = arith.mulf %63, %66 : vector<8x512xf32>
    %c0_43 = arith.constant 0 : index
    %c0_44 = arith.constant 0 : index
    %68 = vector.load %arg10[%c0_43, %c0_44] : memref<72x512xf32, #tpu.memory_space<vmem>>, vector<8x512xf32>
    tpu.vector_store %arg10[%c0_43, %c0_44], %67 {strides = array<i32>} : memref<72x512xf32, #tpu.memory_space<vmem>>, vector<8x512xf32>,
    %c16_i32_45 = arith.constant 16 : i32
    %69 = tpu.dynamic_rotate %62 by %c16_i32_45 dim 1 : vector<8x512xf32>, i32 -> vector<8x512xf32>
    %c1_46 = arith.constant 1 : index
    %c0_47 = arith.constant 0 : index
    %c0_48 = arith.constant 0 : index
    %70 = vector.load %arg2[%c1_46, %c0_47, %c0_48] : memref<9x1x512xf32, #tpu.memory_space<vmem>>, vector<1x1x512xf32>
    %71 = vector.shape_cast %70 : vector<1x1x512xf32> to vector<1x512xf32>
    %72 = vector.broadcast %71 : vector<1x512xf32> to vector<8x512xf32>
    %73 = arith.mulf %69, %72 : vector<8x512xf32>
    %c8_49 = arith.constant 8 : index
    %c0_50 = arith.constant 0 : index
    %74 = vector.load %arg10[%c8_49, %c0_50] : memref<72x512xf32, #tpu.memory_space<vmem>>, vector<8x512xf32>
    tpu.vector_store %arg10[%c8_49, %c0_50], %73 {strides = array<i32>} : memref<72x512xf32, #tpu.memory_space<vmem>>, vector<8x512xf32>,
    %c15_i32_51 = arith.constant 15 : i32
    %75 = tpu.dynamic_rotate %62 by %c15_i32_51 dim 1 : vector<8x512xf32>, i32 -> vector<8x512xf32>
    %c2_52 = arith.constant 2 : index
    %c0_53 = arith.constant 0 : index
    %c0_54 = arith.constant 0 : index
    %76 = vector.load %arg2[%c2_52, %c0_53, %c0_54] : memref<9x1x512xf32, #tpu.memory_space<vmem>>, vector<1x1x512xf32>
    %77 = vector.shape_cast %76 : vector<1x1x512xf32> to vector<1x512xf32>
    %78 = vector.broadcast %77 : vector<1x512xf32> to vector<8x512xf32>
    %79 = arith.mulf %75, %78 : vector<8x512xf32>
    %c16_55 = arith.constant 16 : index
    %c0_56 = arith.constant 0 : index
    %80 = vector.load %arg10[%c16_55, %c0_56] : memref<72x512xf32, #tpu.memory_space<vmem>>, vector<8x512xf32>
    tpu.vector_store %arg10[%c16_55, %c0_56], %79 {strides = array<i32>} : memref<72x512xf32, #tpu.memory_space<vmem>>, vector<8x512xf32>,
    %c1_i32_57 = arith.constant 1 : i32
    %81 = tpu.dynamic_rotate %62 by %c1_i32_57 dim 1 : vector<8x512xf32>, i32 -> vector<8x512xf32>
    %c3_58 = arith.constant 3 : index
    %c0_59 = arith.constant 0 : index
    %c0_60 = arith.constant 0 : index
    %82 = vector.load %arg2[%c3_58, %c0_59, %c0_60] : memref<9x1x512xf32, #tpu.memory_space<vmem>>, vector<1x1x512xf32>
    %83 = vector.shape_cast %82 : vector<1x1x512xf32> to vector<1x512xf32>
    %84 = vector.broadcast %83 : vector<1x512xf32> to vector<8x512xf32>
    %85 = arith.mulf %81, %84 : vector<8x512xf32>
    %c24_61 = arith.constant 24 : index
    %c0_62 = arith.constant 0 : index
    %86 = vector.load %arg10[%c24_61, %c0_62] : memref<72x512xf32, #tpu.memory_space<vmem>>, vector<8x512xf32>
    tpu.vector_store %arg10[%c24_61, %c0_62], %85 {strides = array<i32>} : memref<72x512xf32, #tpu.memory_space<vmem>>, vector<8x512xf32>,
    %c4_63 = arith.constant 4 : index
    %c0_64 = arith.constant 0 : index
    %c0_65 = arith.constant 0 : index
    %87 = vector.load %arg2[%c4_63, %c0_64, %c0_65] : memref<9x1x512xf32, #tpu.memory_space<vmem>>, vector<1x1x512xf32>
    %88 = vector.shape_cast %87 : vector<1x1x512xf32> to vector<1x512xf32>
    %89 = vector.broadcast %88 : vector<1x512xf32> to vector<8x512xf32>
    %90 = arith.mulf %62, %89 : vector<8x512xf32>
    %c32_66 = arith.constant 32 : index
    %c0_67 = arith.constant 0 : index
    %91 = vector.load %arg10[%c32_66, %c0_67] : memref<72x512xf32, #tpu.memory_space<vmem>>, vector<8x512xf32>
    tpu.vector_store %arg10[%c32_66, %c0_67], %90 {strides = array<i32>} : memref<72x512xf32, #tpu.memory_space<vmem>>, vector<8x512xf32>,
    %c511_i32_68 = arith.constant 511 : i32
    %92 = tpu.dynamic_rotate %62 by %c511_i32_68 dim 1 : vector<8x512xf32>, i32 -> vector<8x512xf32>
    %c5_69 = arith.constant 5 : index
    %c0_70 = arith.constant 0 : index
    %c0_71 = arith.constant 0 : index
    %93 = vector.load %arg2[%c5_69, %c0_70, %c0_71] : memref<9x1x512xf32, #tpu.memory_space<vmem>>, vector<1x1x512xf32>
    %94 = vector.shape_cast %93 : vector<1x1x512xf32> to vector<1x512xf32>
    %95 = vector.broadcast %94 : vector<1x512xf32> to vector<8x512xf32>
    %96 = arith.mulf %92, %95 : vector<8x512xf32>
    %c40_72 = arith.constant 40 : index
    %c0_73 = arith.constant 0 : index
    %97 = vector.load %arg10[%c40_72, %c0_73] : memref<72x512xf32, #tpu.memory_space<vmem>>, vector<8x512xf32>
    tpu.vector_store %arg10[%c40_72, %c0_73], %96 {strides = array<i32>} : memref<72x512xf32, #tpu.memory_space<vmem>>, vector<8x512xf32>,
    %c497_i32_74 = arith.constant 497 : i32
    %98 = tpu.dynamic_rotate %62 by %c497_i32_74 dim 1 : vector<8x512xf32>, i32 -> vector<8x512xf32>
    %c6_75 = arith.constant 6 : index
    %c0_76 = arith.constant 0 : index
    %c0_77 = arith.constant 0 : index
    %99 = vector.load %arg2[%c6_75, %c0_76, %c0_77] : memref<9x1x512xf32, #tpu.memory_space<vmem>>, vector<1x1x512xf32>
    %100 = vector.shape_cast %99 : vector<1x1x512xf32> to vector<1x512xf32>
    %101 = vector.broadcast %100 : vector<1x512xf32> to vector<8x512xf32>
    %102 = arith.mulf %98, %101 : vector<8x512xf32>
    %c48_78 = arith.constant 48 : index
    %c0_79 = arith.constant 0 : index
    %103 = vector.load %arg10[%c48_78, %c0_79] : memref<72x512xf32, #tpu.memory_space<vmem>>, vector<8x512xf32>
    tpu.vector_store %arg10[%c48_78, %c0_79], %102 {strides = array<i32>} : memref<72x512xf32, #tpu.memory_space<vmem>>, vector<8x512xf32>,
    %c496_i32_80 = arith.constant 496 : i32
    %104 = tpu.dynamic_rotate %62 by %c496_i32_80 dim 1 : vector<8x512xf32>, i32 -> vector<8x512xf32>
    %c7_81 = arith.constant 7 : index
    %c0_82 = arith.constant 0 : index
    %c0_83 = arith.constant 0 : index
    %105 = vector.load %arg2[%c7_81, %c0_82, %c0_83] : memref<9x1x512xf32, #tpu.memory_space<vmem>>, vector<1x1x512xf32>
    %106 = vector.shape_cast %105 : vector<1x1x512xf32> to vector<1x512xf32>
    %107 = vector.broadcast %106 : vector<1x512xf32> to vector<8x512xf32>
    %108 = arith.mulf %104, %107 : vector<8x512xf32>
    %c56_84 = arith.constant 56 : index
    %c0_85 = arith.constant 0 : index
    %109 = vector.load %arg10[%c56_84, %c0_85] : memref<72x512xf32, #tpu.memory_space<vmem>>, vector<8x512xf32>
    tpu.vector_store %arg10[%c56_84, %c0_85], %108 {strides = array<i32>} : memref<72x512xf32, #tpu.memory_space<vmem>>, vector<8x512xf32>,
    %c495_i32_86 = arith.constant 495 : i32
    %110 = tpu.dynamic_rotate %62 by %c495_i32_86 dim 1 : vector<8x512xf32>, i32 -> vector<8x512xf32>
    %c8_87 = arith.constant 8 : index
    %c0_88 = arith.constant 0 : index
    %c0_89 = arith.constant 0 : index
    %111 = vector.load %arg2[%c8_87, %c0_88, %c0_89] : memref<9x1x512xf32, #tpu.memory_space<vmem>>, vector<1x1x512xf32>
    %112 = vector.shape_cast %111 : vector<1x1x512xf32> to vector<1x512xf32>
    %113 = vector.broadcast %112 : vector<1x512xf32> to vector<8x512xf32>
    %114 = arith.mulf %110, %113 : vector<8x512xf32>
    %c64_90 = arith.constant 64 : index
    %c0_91 = arith.constant 0 : index
    %115 = vector.load %arg10[%c64_90, %c0_91] : memref<72x512xf32, #tpu.memory_space<vmem>>, vector<8x512xf32>
    tpu.vector_store %arg10[%c64_90, %c0_91], %114 {strides = array<i32>} : memref<72x512xf32, #tpu.memory_space<vmem>>, vector<8x512xf32>,
    %c1_92 = arith.constant 1 : index
    %c0_93 = arith.constant 0 : index
    %c0_94 = arith.constant 0 : index
    %116 = vector.load %arg3[%c1_92, %c0_93, %c0_94] : memref<2x8x72xf32, #tpu.memory_space<vmem>>, vector<1x8x72xf32>
    %117 = vector.shape_cast %116 : vector<1x8x72xf32> to vector<8x72xf32>
    %c0_95 = arith.constant 0 : index
    %c0_96 = arith.constant 0 : index
    %118 = vector.load %arg10[%c0_95, %c0_96] : memref<72x512xf32, #tpu.memory_space<vmem>>, vector<72x512xf32>
    %cst_97 = arith.constant dense<0.000000e+00> : vector<8x512xf32>
    %119 = tpu.matmul %117, %118, %cst_97 {dimension_numbers = #tpu.dot_dimension_numbers<[1], [0], [0], [1], [0, 0, 1, 1], [], []>} : vector<8x72xf32>, vector<72x512xf32>, vector<8x512xf32> -> vector<8x512xf32>
    %c1_98 = arith.constant 1 : index
    %c0_99 = arith.constant 0 : index
    %c0_100 = arith.constant 0 : index
    %120 = vector.load %arg4[%c1_98, %c0_99, %c0_100] : memref<2x8x1xf32, #tpu.memory_space<vmem>>, vector<1x8x1xf32>
    %121 = vector.shape_cast %120 : vector<1x8x1xf32> to vector<8x1xf32>
    %122 = vector.broadcast %121 : vector<8x1xf32> to vector<8x512xf32>
    %123 = arith.addf %119, %122 : vector<8x512xf32>
    %124 = math.tanh %123 : vector<8x512xf32>
    %125 = vector.extract_strided_slice %124 {offsets = [0, 0], sizes = [1, 256], strides = [1, 1]} : vector<8x512xf32> to vector<1x256xf32>
    %c0_101 = arith.constant 0 : index
    %c0_102 = arith.constant 0 : index
    %126 = vector.load %arg11[%c0_101, %c0_102] : memref<2x2048xf32, #tpu.memory_space<vmem>>, vector<1x256xf32>
    tpu.vector_store %arg11[%c0_101, %c0_102], %125 {strides = array<i32>} : memref<2x2048xf32, #tpu.memory_space<vmem>>, vector<1x256xf32>,
    %127 = vector.extract_strided_slice %124 {offsets = [1, 0], sizes = [1, 256], strides = [1, 1]} : vector<8x512xf32> to vector<1x256xf32>
    %c0_103 = arith.constant 0 : index
    %c256 = arith.constant 256 : index
    %128 = vector.load %arg11[%c0_103, %c256] : memref<2x2048xf32, #tpu.memory_space<vmem>>, vector<1x256xf32>
    tpu.vector_store %arg11[%c0_103, %c256], %127 {strides = array<i32>} : memref<2x2048xf32, #tpu.memory_space<vmem>>, vector<1x256xf32>,
    %129 = vector.extract_strided_slice %124 {offsets = [2, 0], sizes = [1, 256], strides = [1, 1]} : vector<8x512xf32> to vector<1x256xf32>
    %c0_104 = arith.constant 0 : index
    %c512 = arith.constant 512 : index
    %130 = vector.load %arg11[%c0_104, %c512] : memref<2x2048xf32, #tpu.memory_space<vmem>>, vector<1x256xf32>
    tpu.vector_store %arg11[%c0_104, %c512], %129 {strides = array<i32>} : memref<2x2048xf32, #tpu.memory_space<vmem>>, vector<1x256xf32>,
    %131 = vector.extract_strided_slice %124 {offsets = [3, 0], sizes = [1, 256], strides = [1, 1]} : vector<8x512xf32> to vector<1x256xf32>
    %c0_105 = arith.constant 0 : index
    %c768 = arith.constant 768 : index
    %132 = vector.load %arg11[%c0_105, %c768] : memref<2x2048xf32, #tpu.memory_space<vmem>>, vector<1x256xf32>
    tpu.vector_store %arg11[%c0_105, %c768], %131 {strides = array<i32>} : memref<2x2048xf32, #tpu.memory_space<vmem>>, vector<1x256xf32>,
    %133 = vector.extract_strided_slice %124 {offsets = [4, 0], sizes = [1, 256], strides = [1, 1]} : vector<8x512xf32> to vector<1x256xf32>
    %c0_106 = arith.constant 0 : index
    %c1024 = arith.constant 1024 : index
    %134 = vector.load %arg11[%c0_106, %c1024] : memref<2x2048xf32, #tpu.memory_space<vmem>>, vector<1x256xf32>
    tpu.vector_store %arg11[%c0_106, %c1024], %133 {strides = array<i32>} : memref<2x2048xf32, #tpu.memory_space<vmem>>, vector<1x256xf32>,
    %135 = vector.extract_strided_slice %124 {offsets = [5, 0], sizes = [1, 256], strides = [1, 1]} : vector<8x512xf32> to vector<1x256xf32>
    %c0_107 = arith.constant 0 : index
    %c1280 = arith.constant 1280 : index
    %136 = vector.load %arg11[%c0_107, %c1280] : memref<2x2048xf32, #tpu.memory_space<vmem>>, vector<1x256xf32>
    tpu.vector_store %arg11[%c0_107, %c1280], %135 {strides = array<i32>} : memref<2x2048xf32, #tpu.memory_space<vmem>>, vector<1x256xf32>,
    %137 = vector.extract_strided_slice %124 {offsets = [6, 0], sizes = [1, 256], strides = [1, 1]} : vector<8x512xf32> to vector<1x256xf32>
    %c0_108 = arith.constant 0 : index
    %c1536 = arith.constant 1536 : index
    %138 = vector.load %arg11[%c0_108, %c1536] : memref<2x2048xf32, #tpu.memory_space<vmem>>, vector<1x256xf32>
    tpu.vector_store %arg11[%c0_108, %c1536], %137 {strides = array<i32>} : memref<2x2048xf32, #tpu.memory_space<vmem>>, vector<1x256xf32>,
    %139 = vector.extract_strided_slice %124 {offsets = [7, 0], sizes = [1, 256], strides = [1, 1]} : vector<8x512xf32> to vector<1x256xf32>
    %c0_109 = arith.constant 0 : index
    %c1792 = arith.constant 1792 : index
    %140 = vector.load %arg11[%c0_109, %c1792] : memref<2x2048xf32, #tpu.memory_space<vmem>>, vector<1x256xf32>
    tpu.vector_store %arg11[%c0_109, %c1792], %139 {strides = array<i32>} : memref<2x2048xf32, #tpu.memory_space<vmem>>, vector<1x256xf32>,
    %141 = vector.extract_strided_slice %124 {offsets = [0, 256], sizes = [1, 256], strides = [1, 1]} : vector<8x512xf32> to vector<1x256xf32>
    %c1_110 = arith.constant 1 : index
    %c0_111 = arith.constant 0 : index
    %142 = vector.load %arg11[%c1_110, %c0_111] : memref<2x2048xf32, #tpu.memory_space<vmem>>, vector<1x256xf32>
    tpu.vector_store %arg11[%c1_110, %c0_111], %141 {strides = array<i32>} : memref<2x2048xf32, #tpu.memory_space<vmem>>, vector<1x256xf32>,
    %143 = vector.extract_strided_slice %124 {offsets = [1, 256], sizes = [1, 256], strides = [1, 1]} : vector<8x512xf32> to vector<1x256xf32>
    %c1_112 = arith.constant 1 : index
    %c256_113 = arith.constant 256 : index
    %144 = vector.load %arg11[%c1_112, %c256_113] : memref<2x2048xf32, #tpu.memory_space<vmem>>, vector<1x256xf32>
    tpu.vector_store %arg11[%c1_112, %c256_113], %143 {strides = array<i32>} : memref<2x2048xf32, #tpu.memory_space<vmem>>, vector<1x256xf32>,
    %145 = vector.extract_strided_slice %124 {offsets = [2, 256], sizes = [1, 256], strides = [1, 1]} : vector<8x512xf32> to vector<1x256xf32>
    %c1_114 = arith.constant 1 : index
    %c512_115 = arith.constant 512 : index
    %146 = vector.load %arg11[%c1_114, %c512_115] : memref<2x2048xf32, #tpu.memory_space<vmem>>, vector<1x256xf32>
    tpu.vector_store %arg11[%c1_114, %c512_115], %145 {strides = array<i32>} : memref<2x2048xf32, #tpu.memory_space<vmem>>, vector<1x256xf32>,
    %147 = vector.extract_strided_slice %124 {offsets = [3, 256], sizes = [1, 256], strides = [1, 1]} : vector<8x512xf32> to vector<1x256xf32>
    %c1_116 = arith.constant 1 : index
    %c768_117 = arith.constant 768 : index
    %148 = vector.load %arg11[%c1_116, %c768_117] : memref<2x2048xf32, #tpu.memory_space<vmem>>, vector<1x256xf32>
    tpu.vector_store %arg11[%c1_116, %c768_117], %147 {strides = array<i32>} : memref<2x2048xf32, #tpu.memory_space<vmem>>, vector<1x256xf32>,
    %149 = vector.extract_strided_slice %124 {offsets = [4, 256], sizes = [1, 256], strides = [1, 1]} : vector<8x512xf32> to vector<1x256xf32>
    %c1_118 = arith.constant 1 : index
    %c1024_119 = arith.constant 1024 : index
    %150 = vector.load %arg11[%c1_118, %c1024_119] : memref<2x2048xf32, #tpu.memory_space<vmem>>, vector<1x256xf32>
    tpu.vector_store %arg11[%c1_118, %c1024_119], %149 {strides = array<i32>} : memref<2x2048xf32, #tpu.memory_space<vmem>>, vector<1x256xf32>,
    %151 = vector.extract_strided_slice %124 {offsets = [5, 256], sizes = [1, 256], strides = [1, 1]} : vector<8x512xf32> to vector<1x256xf32>
    %c1_120 = arith.constant 1 : index
    %c1280_121 = arith.constant 1280 : index
    %152 = vector.load %arg11[%c1_120, %c1280_121] : memref<2x2048xf32, #tpu.memory_space<vmem>>, vector<1x256xf32>
    tpu.vector_store %arg11[%c1_120, %c1280_121], %151 {strides = array<i32>} : memref<2x2048xf32, #tpu.memory_space<vmem>>, vector<1x256xf32>,
    %153 = vector.extract_strided_slice %124 {offsets = [6, 256], sizes = [1, 256], strides = [1, 1]} : vector<8x512xf32> to vector<1x256xf32>
    %c1_122 = arith.constant 1 : index
    %c1536_123 = arith.constant 1536 : index
    %154 = vector.load %arg11[%c1_122, %c1536_123] : memref<2x2048xf32, #tpu.memory_space<vmem>>, vector<1x256xf32>
    tpu.vector_store %arg11[%c1_122, %c1536_123], %153 {strides = array<i32>} : memref<2x2048xf32, #tpu.memory_space<vmem>>, vector<1x256xf32>,
    %155 = vector.extract_strided_slice %124 {offsets = [7, 256], sizes = [1, 256], strides = [1, 1]} : vector<8x512xf32> to vector<1x256xf32>
    %c1_124 = arith.constant 1 : index
    %c1792_125 = arith.constant 1792 : index
    %156 = vector.load %arg11[%c1_124, %c1792_125] : memref<2x2048xf32, #tpu.memory_space<vmem>>, vector<1x256xf32>
    tpu.vector_store %arg11[%c1_124, %c1792_125], %155 {strides = array<i32>} : memref<2x2048xf32, #tpu.memory_space<vmem>>, vector<1x256xf32>,
    %c0_126 = arith.constant 0 : index
    %c0_127 = arith.constant 0 : index
    %157 = vector.load %arg11[%c0_126, %c0_127] : memref<2x2048xf32, #tpu.memory_space<vmem>>, vector<2x2048xf32>
    %c0_128 = arith.constant 0 : index
    %c0_129 = arith.constant 0 : index
    %158 = vector.load %arg5[%c0_128, %c0_129] : memref<2048x32xf32, #tpu.memory_space<vmem>>, vector<2048x32xf32>
    %cst_130 = arith.constant dense<0.000000e+00> : vector<2x32xf32>
    %159 = tpu.matmul %157, %158, %cst_130 {dimension_numbers = #tpu.dot_dimension_numbers<[1], [0], [0], [1], [0, 0, 1, 1], [], []>} : vector<2x2048xf32>, vector<2048x32xf32>, vector<2x32xf32> -> vector<2x32xf32>
    %c0_131 = arith.constant 0 : index
    %c0_132 = arith.constant 0 : index
    %160 = vector.load %arg6[%c0_131, %c0_132] : memref<1x32xf32, #tpu.memory_space<vmem>>, vector<1x32xf32>
    %161 = vector.broadcast %160 : vector<1x32xf32> to vector<2x32xf32>
    %162 = arith.addf %159, %161 : vector<2x32xf32>
    %163 = math.tanh %162 : vector<2x32xf32>
    %c0_133 = arith.constant 0 : index
    %c0_134 = arith.constant 0 : index
    %164 = vector.load %arg7[%c0_133, %c0_134] : memref<32x10xf32, #tpu.memory_space<vmem>>, vector<32x10xf32>
    %cst_135 = arith.constant dense<0.000000e+00> : vector<2x10xf32>
    %165 = tpu.matmul %163, %164, %cst_135 {dimension_numbers = #tpu.dot_dimension_numbers<[1], [0], [0], [1], [0, 0, 1, 1], [], []>} : vector<2x32xf32>, vector<32x10xf32>, vector<2x10xf32> -> vector<2x10xf32>
    %c0_136 = arith.constant 0 : index
    %c0_137 = arith.constant 0 : index
    %166 = vector.load %arg8[%c0_136, %c0_137] : memref<1x10xf32, #tpu.memory_space<vmem>>, vector<1x10xf32>
    %167 = vector.broadcast %166 : vector<1x10xf32> to vector<2x10xf32>
    %168 = arith.addf %165, %167 : vector<2x10xf32>
    %c0_138 = arith.constant 0 : index
    %c0_139 = arith.constant 0 : index
    %169 = vector.load %arg9[%c0_138, %c0_139] : memref<2x10xf32, #tpu.memory_space<vmem>>, vector<2x10xf32>
    tpu.vector_store %arg9[%c0_138, %c0_139], %168 {strides = array<i32>} : memref<2x10xf32, #tpu.memory_space<vmem>>, vector<2x10xf32>,
    return
  }
  func.func @transform_0(%arg0: i32) -> (i32, i32) {
    %c0_i32 = arith.constant 0 : i32
    %c0_i32_0 = arith.constant 0 : i32
    return %c0_i32, %arg0 : i32, i32
  }
  func.func @transform_1(%arg0: i32) -> (i32, i32, i32) {
    %c0_i32 = arith.constant 0 : i32
    %c0_i32_0 = arith.constant 0 : i32
    %c0_i32_1 = arith.constant 0 : i32
    %c0_i32_2 = arith.constant 0 : i32
    return %c0_i32, %c0_i32_0, %c0_i32_1 : i32, i32, i32
  }
  func.func @transform_2(%arg0: i32) -> (i32, i32, i32) {
    %c0_i32 = arith.constant 0 : i32
    %c0_i32_0 = arith.constant 0 : i32
    %c0_i32_1 = arith.constant 0 : i32
    %c0_i32_2 = arith.constant 0 : i32
    return %c0_i32, %c0_i32_0, %c0_i32_1 : i32, i32, i32
  }
  func.func @transform_3(%arg0: i32) -> (i32, i32, i32) {
    %c0_i32 = arith.constant 0 : i32
    %c0_i32_0 = arith.constant 0 : i32
    %c0_i32_1 = arith.constant 0 : i32
    %c0_i32_2 = arith.constant 0 : i32
    return %c0_i32, %c0_i32_0, %c0_i32_1 : i32, i32, i32
  }
  func.func @transform_4(%arg0: i32) -> (i32, i32) {
    %c0_i32 = arith.constant 0 : i32
    %c0_i32_0 = arith.constant 0 : i32
    %c0_i32_1 = arith.constant 0 : i32
    return %c0_i32, %c0_i32_0 : i32, i32
  }
  func.func @transform_5(%arg0: i32) -> (i32, i32) {
    %c0_i32 = arith.constant 0 : i32
    %c0_i32_0 = arith.constant 0 : i32
    %c0_i32_1 = arith.constant 0 : i32
    return %c0_i32, %c0_i32_0 : i32, i32
  }
  func.func @transform_6(%arg0: i32) -> (i32, i32) {
    %c0_i32 = arith.constant 0 : i32
    %c0_i32_0 = arith.constant 0 : i32
    %c0_i32_1 = arith.constant 0 : i32
    return %c0_i32, %c0_i32_0 : i32, i32
  }
  func.func @transform_7(%arg0: i32) -> (i32, i32) {
    %c0_i32 = arith.constant 0 : i32
    %c0_i32_0 = arith.constant 0 : i32
    %c0_i32_1 = arith.constant 0 : i32
    return %c0_i32, %c0_i32_0 : i32, i32
  }
  func.func @transform_8(%arg0: i32) -> (i32, i32) {
    %c0_i32 = arith.constant 0 : i32
    %c0_i32_0 = arith.constant 0 : i32
    return %arg0, %c0_i32 : i32, i32
  }
}

</mosaic_0001>

<bundles_post_ra>
// kernel: conv_network_forward.1
= control target key start
LH: loop header
LB: loop body
LE: loop exit
PB: predicated region body
PF: predicated region fallthrough
CT: control target
= control target key end

     0   :  { %s1708_s29 = smov 113   ;;  %s1709_s30 = smov 112   ;;  %s3214_s0 = inlined_call_operand.vmem [shape: f32[8,512], index: 0, kind: input, shape index: {}]   ;;  %s3215_s1 = inlined_call_operand.vmem [shape: f32[9,1,512], index: 1, kind: input, shape index: {}]   ;;  %s3216_s2 = inlined_call_operand.vmem [shape: f32[2,8,72], index: 2, kind: input, shape index: {}]   ;;  %s3217_s3 = inlined_call_operand.vmem [shape: f32[2,8,1], index: 3, kind: input, shape index: {}]   ;;  %s3218_s4 = inlined_call_operand.vmem [shape: f32[2048,32], index: 4, kind: input, shape index: {}]   ;;  %s3219_s5 = inlined_call_operand.vmem [shape: f32[1,32], index: 5, kind: input, shape index: {}]   ;;  %s3220_s6 = inlined_call_operand.vmem [shape: f32[32,10], index: 6, kind: input, shape index: {}]   ;;  %s3221_s7 = inlined_call_operand.vmem [shape: f32[1,10], index: 7, kind: input, shape index: {}]   ;;  %s3222_s8 = inlined_call_operand.hbm [shape: f32[2,10], index: 8, kind: output, shape index: {}]  }
   0x1   :  { %v1766_v0 = vld [vmem:[%s3214_s0 + $0x10] sm:$0xff]  ;;  %s1710_s9 = smov 111  }
   0x2   :  { %218 = vrot.lane.b32.xlu2 %v1766_v0, %s1708_s29  ;;  %250 = vrot.lane.b32.xlu1 %v1766_v0, %s1709_s30 }
   0x3   :  { %282 = vrot.lane.b32.xlu0 %v1766_v0, %s1710_s9 }
   0x4   :  { %13 = vsyncpa [#allocation5], 0  ;;  %v1777_v1 = vld [vmem:[%s3214_s0 + $0x18] sm:$0xff]  ;;  %v1788_v2 = vld [vmem:[%s3214_s0] sm:$0xff]  ;;  %s1711_s14 = smov 127   ;;  %s1712_s17 = smov 1   ;;  %v42_v7 = vlaneseq }
   0x5   :  { %v1799_v3 = vld [vmem:[%s3214_s0 + $0x8] sm:$0xff]  ;;  %s1713_s0 = smov 15   ;;  %s1714_s18 = smov 16   ;;  %v1630_v10 = vld [vmem:[%s3215_s1 + $0x20] sm:$0xf]  ;;  %vm353_vm8 = vcmask 588800  }
   0x6   :  { %s1715_s19 = smov 17   ;;  %v1853_v11 = vand.u32 127, %v42_v7  ;;  %v296_v12 = vperm.slane %v1630_v10, 2  ;;  %v297_v13 = vperm.slane %v1630_v10, 3  ;;  %v1629_v15 = vld [vmem:[%s3215_s1 + $0x1c] sm:$0xf] }
   0x7   :  { %v1862_v16 = vld [vmem:[%s3215_s1 + $0x18] sm:$0xf]  ;;  %v264_v18 = vperm.slane %v1629_v15, 2  ;;  %v1879_v27 = vld [vmem:[%s3215_s1 + $0x14] sm:$0xf]  ;;  %v265_v39 = vperm.slane %v1629_v15, 3 }
   0x8   :  { %vm286_vm0 = vcmp.lt.s32.totalorder %v1853_v11, 111  ;;  %vm222_vm1 = vcmp.lt.s32.totalorder %v1853_v11, 113  ;;  %vm254_vm2 = vcmp.lt.s32.totalorder %v1853_v11, 112  ;;  %v232_v24 = vperm.slane %v1862_v16, 2  ;;  %v1884_v28 = vld [vmem:[%s3215_s1 + $0x10] sm:$0xf] }
   0x9   :  { %vm190_vm3 = vcmp.lt.s32.totalorder %v1853_v11, 127  ;;  %v200_v31 = vperm.slane %v1879_v27, 2  ;;  %v168_v32 = vperm.slane %v1884_v28, 2  ;;  %v294_v40 = vperm.slane %v1630_v10, 0  ;;  %v1914_v57 = vld [vmem:[%s3215_s1 + $0xc] sm:$0xf] }
   0xa   :  { %220 = vrot.lane.b32.xlu2 %v1777_v1, %s1708_s29  ;;  %252 = vrot.lane.b32.xlu1 %v1777_v1, %s1709_s30  ;;  %v295_v41 = vperm.slane %v1630_v10, 1  ;;  %v263_v43 = vperm.slane %v1629_v15, 1  ;;  %v233_v44 = vperm.slane %v1862_v16, 3  ;;  %v262_v49 = vperm.slane %v1629_v15, 0  ;;  %s1717_s24 = smov [#allocation4]   ;;  %s1614_s28 = sshll.u32 %s3222_s8, 4  ;;  %s1615_s28 = int_to_ptr.hbm [resolvable:$true] %s1614_s28 }
   0xb   :  { %284 = vrot.lane.b32.xlu0 %v1777_v1, %s1710_s9  ;;  %v176_v37 = vmul.f32 %v168_v32, %v1766_v0  ;;  %vm139_vm4 = vcmp.lt.s32.totalorder %v1853_v11, 1  ;;  %v149_v60 = vperm.slane %v1914_v57, 2  ;;  %vm107_vm5 = vcmp.lt.s32.totalorder %v1853_v11, 15  ;;  %s1612_s25 = sshll.u32 %s1717_s24, 4  ;;  %s1613_s25 = int_to_ptr.vmem [resolvable:$true] %s1612_s25 }
   0xc   :  { %v231_v10 = vperm.slane %v1862_v16, 1  ;;  %vm75_vm6 = vcmp.lt.s32.totalorder %v1853_v11, 16  ;;  %vm44_vm7 = vcmp.lt.s32.totalorder %v1853_v11, 17  ;;  %vm834_vm9 = vcmask 1040384  }
   0xd   :  { %vm2352_vm10 = vcmp.lt.s32.totalorder %v42_v7, 256  ;;  %vm1581_vm11 = vcmask 261120   ;;  %vm1605_vm12 = vcmask 74752  }
  0x12   :  { %188 = vrot.lane.b32.xlu1 %v1777_v1, %s1711_s14  ;;  %278 = vrot.lane.b32.xlu2 %v1788_v2, %s1710_s9 }
  0x13   :  { %186 = vrot.lane.b32.xlu0 %v1766_v0, %s1711_s14 }
  0x1a   :  { %246 = vrot.lane.b32.xlu1 %v1788_v2, %s1709_s30  ;;  %248 = vrot.lane.b32.xlu2 %v1799_v3, %s1709_s30 }
  0x1b   :  { %280 = vrot.lane.b32.xlu0 %v1799_v3, %s1710_s9 }
  0x22   :  { %135 = vrot.lane.b32.xlu1 %v1766_v0, %s1712_s17  ;;  %214 = vrot.lane.b32.xlu2 %v1788_v2, %s1708_s29 }
  0x23   :  { %133 = vrot.lane.b32.xlu0 %v1799_v3, %s1712_s17 }
  0x2a   :  { %101 = vrot.lane.b32.xlu1 %v1799_v3, %s1713_s0  ;;  %103 = vrot.lane.b32.xlu2 %v1766_v0, %s1713_s0 }
  0x2b   :  { %216 = vrot.lane.b32.xlu0 %v1799_v3, %s1708_s29 }
  0x32   :  { %184 = vrot.lane.b32.xlu1 %v1799_v3, %s1711_s14  ;;  %69 = vrot.lane.b32.xlu2 %v1799_v3, %s1714_s18 }
  0x33   :  { %182 = vrot.lane.b32.xlu0 %v1788_v2, %s1711_s14 }
  0x3a   :  { %36 = vrot.lane.b32.xlu1 %v1799_v3, %s1715_s19  ;;  %38 = vrot.lane.b32.xlu2 %v1766_v0, %s1715_s19 }
  0x3b   :  { %71 = vrot.lane.b32.xlu0 %v1766_v0, %s1714_s18 }
  0x42   :  { %137 = vrot.lane.b32.xlu1 %v1777_v1, %s1712_s17  ;;  %99 = vrot.lane.b32.xlu2 %v1788_v2, %s1713_s0 }
  0x43   :  { %131 = vrot.lane.b32.xlu0 %v1788_v2, %s1712_s17 }
  0x4a   :  { %67 = vrot.lane.b32.xlu1 %v1788_v2, %s1714_s18  ;;  %73 = vrot.lane.b32.xlu2 %v1777_v1, %s1714_s18 }
  0x4b   :  { %105 = vrot.lane.b32.xlu0 %v1777_v1, %s1713_s0 }
  0x52   :  { %40 = vrot.lane.b32.xlu1 %v1777_v1, %s1715_s19 }
  0x53   :  { %34 = vrot.lane.b32.xlu0 %v1788_v2, %s1715_s19 }
  0x5c   :  { %v1847_v4 = vpop.permute.xlu2 %218 }
  0x64   :  { %v221_v5 = vpop.permute.xlu2 %220 }
  0x65   :  { %v223_v25 = vsel %vm222_vm1, %v1847_v4, %v221_v5 }
  0x66   :  { %v240_v30 = vmul.f32 %v232_v24, %v223_v25  ;;  %v201_v24 = vperm.slane %v1879_v27, 3  ;;  %v166_v25 = vperm.slane %v1884_v28, 0 }
  0x6c   :  { %v279_v9 = vpop.permute.xlu2 %278 }
  0x74   :  { %v251_v6 = vpop.permute.xlu1 %250  ;;  %v249_v26 = vpop.permute.xlu2 %248 }
  0x75   :  { %v283_v8 = vpop.permute.xlu0 %282  ;;  %v256_v45 = vsel %vm254_vm2, %v249_v26, %v251_v6 }
  0x76   :  { %v271_v59 = vmul.f32 %v263_v43, %v256_v45 }
  0x7c   :  { %v253_v14 = vpop.permute.xlu1 %252  ;;  %v215_v38 = vpop.permute.xlu2 %214 }
  0x7d   :  { %v285_v17 = vpop.permute.xlu0 %284  ;;  %v255_v19 = vsel %vm254_vm2, %v251_v6, %v253_v14  ;;  %v226_v46 = vsel %vm222_vm1, %v221_v5, %v215_v38  ;;  %v1931_v6 = vld [vmem:[%s3215_s1 + $0x8] sm:$0xf] }
  0x7e   :  { %v287_v20 = vsel %vm286_vm0, %v283_v8, %v285_v17  ;;  %v290_v21 = vsel %vm286_vm0, %v285_v17, %v279_v9  ;;  %v272_v29 = vmul.f32 %v264_v18, %v255_v19  ;;  %v241_v56 = vmul.f32 %v233_v44, %v226_v46 }
  0x7f   :  { %v304_v22 = vmul.f32 %v296_v12, %v287_v20  ;;  %v305_v23 = vmul.f32 %v297_v13, %v290_v21  ;;  %v199_v21 = vperm.slane %v1879_v27, 1 }
  0x81   :  { %404 = vmatpush.msra.mxu2 %v304_v22  ;;  %424 = vmatpush.msra.mxu3 %v305_v23  ;;  %v167_v22 = vperm.slane %v1884_v28, 1  ;;  %v198_v23 = vperm.slane %v1879_v27, 0 }
  0x83   :  { %405 = vmatpush.msra.mxu2 %v272_v29  ;;  %v175_v27 = vmul.f32 %v167_v22, %v1799_v3  ;;  %v1977_v3 = vld [vmem:[%s3215_s1] sm:$0xf] }
  0x84   :  { %v1889_v33 = vpop.permute.xlu1 %188  ;;  %v1918_v61 = vpop.permute.xlu2 %103 }
  0x85   :  { %406 = vmatpush.msra.mxu2 %v240_v30  ;;  %v1891_v34 = vpop.permute.xlu0 %186 }
  0x86   :  { %v191_v35 = vsel %vm190_vm3, %v1891_v34, %v1889_v33 }
  0x87   :  { %v208_v36 = vmul.f32 %v200_v31, %v191_v35 }
  0x89   :  { %407 = vmatpush.msra.mxu2 %v208_v36 }
  0x8b   :  { %408 = vmatpush.msra.mxu2 %v176_v37 }
  0x8c   :  { %v247_v42 = vpop.permute.xlu1 %246  ;;  %v1943_v15 = vpop.permute.xlu2 %69 }
  0x8d   :  { %v281_v47 = vpop.permute.xlu0 %280  ;;  %v258_v48 = vsel %vm254_vm2, %v253_v14, %v247_v42  ;;  %v257_v50 = vsel %vm254_vm2, %v247_v42, %v249_v26  ;;  %v53_v42 = vperm.slane %v1977_v3, 2 }
  0x8e   :  { %v289_v51 = vsel %vm286_vm0, %v279_v9, %v281_v47  ;;  %v288_v52 = vsel %vm286_vm0, %v281_v47, %v283_v8  ;;  %v273_v53 = vmul.f32 %v265_v39, %v258_v48  ;;  %v270_v58 = vmul.f32 %v262_v49, %v257_v50  ;;  %v310_v47 = vld [vmem:[%s3216_s2] sm:$0xff] }
  0x8f   :  { %v302_v54 = vmul.f32 %v294_v40, %v289_v51  ;;  %v303_v55 = vmul.f32 %v295_v41, %v288_v52  ;;  %v117_v8 = vperm.slane %v1931_v6, 2  ;;  %v230_v9 = vperm.slane %v1862_v16, 0 }
  0x90   :  { %425 = vmatpush.msra.mxu3 %v273_v53  ;;  %v1716_v40 = vmov 0   ;;  %v150_v49 = vperm.slane %v1914_v57, 3  ;;  %v147_v50 = vperm.slane %v1914_v57, 0  ;;  %v148_v51 = vperm.slane %v1914_v57, 1 }
  0x91   :  { %364 = vmatpush.msra.mxu0 %v302_v54  ;;  %384 = vmatpush.msra.mxu1 %v303_v55  ;;  %v116_v55 = vperm.slane %v1931_v6, 1 }
  0x92   :  { %426 = vmatpush.msra.mxu3 %v241_v56  ;;  %1660 = vset.pattern.permute.xlu2 %v1716_v40 }
  0x93   :  { %365 = vmatpush.msra.mxu0 %v270_v58  ;;  %385 = vmatpush.msra.mxu1 %v271_v59 }
  0x94   :  { %v1920_v62 = vpop.permute.xlu1 %135  ;;  %v1967_v39 = vpop.permute.xlu2 %38  ;;  %1661 = vset.pattern.permute.xlu0 %v1716_v40 }
  0x95   :  { %v1922_v63 = vpop.permute.xlu0 %133 }
  0x96   :  { %v141_v0 = vsel %vm139_vm4, %v1922_v63, %v1920_v62 }
  0x97   :  { %v157_v5 = vmul.f32 %v149_v60, %v141_v0 }
  0x99   :  { %409 = vmatpush.msra.mxu2 %v157_v5 }
  0x9c   :  { %v1937_v12 = vpop.permute.xlu1 %101  ;;  %v100_v48 = vpop.permute.xlu2 %99 }
  0x9d   :  { %v217_v13 = vpop.permute.xlu0 %216  ;;  %v109_v14 = vsel %vm107_vm5, %v1937_v12, %v1918_v61  ;;  %v110_v56 = vsel %vm107_vm5, %v100_v48, %v1937_v12 }
  0x9e   :  { %v224_v17 = vsel %vm222_vm1, %v217_v13, %v1847_v4  ;;  %v225_v18 = vsel %vm222_vm1, %v215_v38, %v217_v13  ;;  %v125_v19 = vmul.f32 %v117_v8, %v109_v14  ;;  %v169_v4 = vperm.slane %v1884_v28, 3 }
  0x9f   :  { %v238_v20 = vmul.f32 %v230_v9, %v225_v18  ;;  %v239_v16 = vmul.f32 %v231_v10, %v224_v17  ;;  %v174_v28 = vmul.f32 %v166_v25, %v1788_v2  ;;  %v347_v2 = vld [vmem:[%s3217_s3] sm:$0xff]  ;;  %v115_v9 = vperm.slane %v1931_v6, 0 }
  0xa0   :  { %410 = vmatpush.msra.mxu2 %v125_v19  ;;  %v177_v38 = vmul.f32 %v169_v4, %v1777_v1  ;;  %350 = vperm.xlu2 %1660, %v347_v2   ;;  %v118_v10 = vperm.slane %v1931_v6, 3  ;;  %v52_v25 = vperm.slane %v1977_v3, 1 }
  0xa1   :  { %366 = vmatpush.msra.mxu0 %v238_v20  ;;  %386 = vmatpush.msra.mxu1 %v239_v16 }
  0xa4   :  { %v185_v26 = vpop.permute.xlu1 %184  ;;  %v74_v5 = vpop.permute.xlu2 %73 }
  0xa5   :  { %v183_v29 = vpop.permute.xlu0 %182  ;;  %v192_v30 = vsel %vm190_vm3, %v185_v26, %v1891_v34  ;;  %v1972_v34 = vld [vmem:[%s3215_s1 + $0x4] sm:$0xf] }
  0xa6   :  { %v194_v31 = vsel %vm190_vm3, %v1889_v33, %v183_v29  ;;  %v193_v32 = vsel %vm190_vm3, %v183_v29, %v185_v26  ;;  %v207_v35 = vmul.f32 %v199_v21, %v192_v30  ;;  %v85_v1 = vperm.slane %v1972_v34, 2 }
  0xa7   :  { %v206_v36 = vmul.f32 %v198_v23, %v193_v32  ;;  %v209_v37 = vmul.f32 %v201_v24, %v194_v31  ;;  %v84_v8 = vperm.slane %v1972_v34, 1  ;;  %v83_v17 = vperm.slane %v1972_v34, 0 }
  0xa8   :  { %387 = vmatpush.msra.mxu1 %v207_v35  ;;  %v86_v18 = vperm.slane %v1972_v34, 3  ;;  %v54_v24 = vperm.slane %v1977_v3, 3 }
  0xa9   :  { %367 = vmatpush.msra.mxu0 %v206_v36  ;;  %427 = vmatpush.msra.mxu3 %v209_v37 }
  0xaa   :  { %388 = vmatpush.msra.mxu1 %v175_v27 }
  0xab   :  { %368 = vmatpush.msra.mxu0 %v174_v28  ;;  %428 = vmatpush.msra.mxu3 %v177_v38 }
  0xac   :  { %v1985_v33 = vpop.permute.xlu1 %36 }
  0xad   :  { %v72_v41 = vpop.permute.xlu0 %71  ;;  %v46_v44 = vsel %vm44_vm7, %v1985_v33, %v1967_v39 }
  0xae   :  { %v77_v43 = vsel %vm75_vm6, %v1943_v15, %v72_v41  ;;  %v61_v46 = vmul.f32 %v53_v42, %v46_v44 }
  0xaf   :  { %v93_v45 = vmul.f32 %v85_v1, %v77_v43  ;;  %v1644_v43 = vld [vmem:[%s3217_s3 + $0x8] sm:$0xff] }
  0xb1   :  { %411 = vmatpush.msra.mxu2 %v93_v45 }
  0xb3   :  { %412 = vmatpush.msra.mxu2 %v61_v46  ;;  %v2127_v46 = vld [vmem:[%s3215_s1 + $0x20] sm:$0xf] }
  0xb4   :  { %1633 = vmatmul.msk.f32.vlgmr.msra.gmra.mxu2 %vm353_vm8, %v310_v47  ;;  %v138_v52 = vpop.permute.xlu1 %137 }
  0xb5   :  { %v132_v53 = vpop.permute.xlu0 %131  ;;  %v140_v54 = vsel %vm139_vm4, %v1920_v62, %v138_v52  ;;  %v124_v62 = vmul.f32 %v116_v55, %v110_v56  ;;  %v2144_v56 = vld [vmem:[%s3215_s1 + $0x1c] sm:$0xf] }
  0xb6   :  { %v142_v58 = vsel %vm139_vm4, %v132_v53, %v1922_v63  ;;  %v143_v57 = vsel %vm139_vm4, %v138_v52, %v132_v53  ;;  %v158_v59 = vmul.f32 %v150_v49, %v140_v54  ;;  %v76_v63 = vsel %vm75_vm6, %v72_v41, %v74_v5 }
  0xb7   :  { %v155_v60 = vmul.f32 %v147_v50, %v143_v57  ;;  %v156_v0 = vmul.f32 %v148_v51, %v142_v58  ;;  %v94_v23 = vmul.f32 %v86_v18, %v76_v63  ;;  %v653_v58 = vperm.slane %v2144_v56, 0 }
  0xb8   :  { %429 = vmatpush.msra.mxu3 %v158_v59  ;;  %v654_v57 = vperm.slane %v2144_v56, 1 }
  0xb9   :  { %369 = vmatpush.msra.mxu0 %v155_v60  ;;  %389 = vmatpush.msra.mxu1 %v156_v0 }
  0xbb   :  { %390 = vmatpush.msra.mxu1 %v124_v62 }
  0xbc   :  { %v68_v12 = vpop.permute.xlu1 %67 }
  0xbd   :  { %v106_v13 = vpop.permute.xlu0 %105  ;;  %v78_v14 = vsel %vm75_vm6, %v68_v12, %v1943_v15  ;;  %v79_v20 = vsel %vm75_vm6, %v74_v5, %v68_v12 }
  0xbe   :  { %v108_v19 = vsel %vm107_vm5, %v1918_v61, %v106_v13  ;;  %v111_v6 = vsel %vm107_vm5, %v106_v13, %v100_v48  ;;  %v92_v16 = vmul.f32 %v84_v8, %v78_v14  ;;  %v91_v15 = vmul.f32 %v83_v17, %v79_v20  ;;  %v2176_v20 = vld [vmem:[%s3215_s1 + $0x14] sm:$0xf] }
  0xbf   :  { %v123_v21 = vmul.f32 %v115_v9, %v111_v6  ;;  %v126_v22 = vmul.f32 %v118_v10, %v108_v19  ;;  %v51_v61 = vperm.slane %v1977_v3, 0  ;;  %v684_v48 = vperm.slane %v2127_v46, 1  ;;  %v2159_v9 = vld [vmem:[%s3215_s1 + $0x18] sm:$0xf] }
  0xc0   :  { %391 = vmatpush.msra.mxu1 %v92_v16  ;;  %v623_v12 = vperm.slane %v2159_v9, 0  ;;  %v624_v63 = vperm.slane %v2159_v9, 1  ;;  %v2181_v16 = vld [vmem:[%s3215_s1 + $0x10] sm:$0xf] }
  0xc1   :  { %370 = vmatpush.msra.mxu0 %v123_v21  ;;  %430 = vmatpush.msra.mxu3 %v126_v22  ;;  %v593_v21 = vperm.slane %v2176_v20, 0  ;;  %v594_v22 = vperm.slane %v2176_v20, 1 }
  0xc3   :  { %371 = vmatpush.msra.mxu0 %v91_v15  ;;  %431 = vmatpush.msra.mxu3 %v94_v23 }
  0xc4   :  { %v41_v4 = vpop.permute.xlu1 %40 }
  0xc5   :  { %v35_v26 = vpop.permute.xlu0 %34  ;;  %v45_v29 = vsel %vm44_vm7, %v1967_v39, %v41_v4 }
  0xc6   :  { %v47_v30 = vsel %vm44_vm7, %v35_v26, %v1985_v33  ;;  %v48_v31 = vsel %vm44_vm7, %v41_v4, %v35_v26  ;;  %v62_v32 = vmul.f32 %v54_v24, %v45_v29 }
  0xc7   :  { %v59_v35 = vmul.f32 %v51_v61, %v48_v31  ;;  %v60_v27 = vmul.f32 %v52_v25, %v47_v30  ;;  %v563_v61 = vperm.slane %v2181_v16, 0  ;;  %v564_v25 = vperm.slane %v2181_v16, 1  ;;  %v2200_v31 = vld [vmem:[%s3215_s1 + $0xc] sm:$0xf] }
  0xc8   :  { %432 = vmatpush.msra.mxu3 %v62_v32 }
  0xc9   :  { %372 = vmatpush.msra.mxu0 %v59_v35  ;;  %392 = vmatpush.msra.mxu1 %v60_v27  ;;  %v545_v27 = vperm.slane %v2200_v31, 0 }
  0xca   :  { %1631 = vmatmul.msk.f32.vlgmr.msra.gmra.mxu0 %vm353_vm8, %v310_v47  ;;  %1632 = vmatmul.msk.f32.vlgmr.msra.gmra.mxu1 %vm353_vm8, %v310_v47 }
  0xcb   :  { %1634 = vmatmul.msk.f32.vlgmr.msra.gmra.mxu3 %vm353_vm8, %v310_v47  ;;  %v683_v47 = vperm.slane %v2127_v46, 0 }
  0xfa   :  { %v351_v36 = vpop.permute.xlu2 %350 }
 0x137   :  { %v414_v37 = vpop.f32.mrf.mxu2 }
 0x138   :  { %v415_v28 = vadd.f32 %v414_v37, %v351_v36 }
 0x13a   :  { %1664 = vtanh.f32 %v415_v28 }
 0x140   :  { %v2045_v38 = vpop.eup %1664 }
 0x141   :  { %673 = vrot.lane.b32.xlu2 %v2045_v38, %s1710_s9 }
 0x147   :  { %v374_v39 = vpop.f32.mrf.mxu0  ;;  %v394_v34 = vpop.f32.mrf.mxu1 }
 0x148   :  { %v375_v3 = vadd.f32 %v374_v39, %v351_v36  ;;  %v395_v1 = vadd.f32 %v394_v34, %v351_v36 }
 0x149   :  { %643 = vrot.lane.b32.xlu2 %v2045_v38, %s1709_s30 }
 0x14a   :  { %1666 = vtanh.f32 %v375_v3 }
 0x14b   :  { %1668 = vtanh.f32 %v395_v1 }
 0x14e   :  { %v434_v40 = vpop.f32.mrf.mxu3 }
 0x14f   :  { %v435_v41 = vadd.f32 %v434_v40, %v351_v36  ;;  %v546_v36 = vperm.slane %v2200_v31, 1 }
 0x150   :  { %v2051_v2 = vpop.eup %1666 }
 0x151   :  { %v2053_v33 = vpop.eup %1668  ;;  %613 = vrot.lane.b32.xlu2 %v2045_v38, %s1708_s29  ;;  %669 = vrot.lane.b32.xlu0 %v2051_v2, %s1710_s9  ;;  %1670 = vtanh.f32 %v435_v41  ;;  %v571_v32 = vmul.f32 %v2051_v2, %v563_v61  ;;  %v2268_v61 = vld [vmem:[%s3216_s2 + $0x8] sm:$0xff] }
 0x152   :  { %671 = vrot.lane.b32.xlu1 %v2053_v33, %s1710_s9  ;;  %v572_v35 = vmul.f32 %v2053_v33, %v564_v25 }
 0x157   :  { %v2067_v42 = vpop.eup %1670 }
 0x159   :  { %583 = vrot.lane.b32.xlu2 %v2045_v38, %s1711_s14  ;;  %639 = vrot.lane.b32.xlu0 %v2051_v2, %s1709_s30 }
 0x15a   :  { %641 = vrot.lane.b32.xlu1 %v2053_v33, %s1709_s30 }
 0x161   :  { %537 = vrot.lane.b32.xlu2 %v2067_v42, %s1712_s17  ;;  %609 = vrot.lane.b32.xlu0 %v2051_v2, %s1708_s29 }
 0x162   :  { %611 = vrot.lane.b32.xlu1 %v2053_v33, %s1708_s29 }
 0x169   :  { %507 = vrot.lane.b32.xlu2 %v2067_v42, %s1713_s0  ;;  %579 = vrot.lane.b32.xlu0 %v2051_v2, %s1711_s14 }
 0x16a   :  { %581 = vrot.lane.b32.xlu1 %v2053_v33, %s1711_s14 }
 0x171   :  { %477 = vrot.lane.b32.xlu2 %v2067_v42, %s1714_s18  ;;  %531 = vrot.lane.b32.xlu0 %v2051_v2, %s1712_s17 }
 0x172   :  { %533 = vrot.lane.b32.xlu1 %v2053_v33, %s1712_s17 }
 0x179   :  { %447 = vrot.lane.b32.xlu2 %v2067_v42, %s1715_s19  ;;  %501 = vrot.lane.b32.xlu0 %v2051_v2, %s1713_s0 }
 0x17a   :  { %503 = vrot.lane.b32.xlu1 %v2053_v33, %s1713_s0 }
 0x181   :  { %615 = vrot.lane.b32.xlu2 %v2067_v42, %s1708_s29  ;;  %471 = vrot.lane.b32.xlu0 %v2051_v2, %s1714_s18 }
 0x182   :  { %473 = vrot.lane.b32.xlu1 %v2053_v33, %s1714_s18 }
 0x189   :  { %505 = vrot.lane.b32.xlu2 %v2045_v38, %s1713_s0  ;;  %441 = vrot.lane.b32.xlu0 %v2051_v2, %s1715_s19 }
 0x18a   :  { %443 = vrot.lane.b32.xlu1 %v2053_v33, %s1715_s19  ;;  %v2219_v33 = vld [vmem:[%s3215_s1 + $0x8] sm:$0xf] }
 0x18b   :  { %v515_v40 = vperm.slane %v2219_v33, 0  ;;  %v516_v41 = vperm.slane %v2219_v33, 1 }
 0x191   :  { %741 = vperm.xlu2 %1660, %v1644_v43   ;;  %675 = vrot.lane.b32.xlu0 %v2067_v42, %s1710_s9 }
 0x192   :  { %645 = vrot.lane.b32.xlu1 %v2067_v42, %s1709_s30 }
 0x199   :  { %585 = vrot.lane.b32.xlu0 %v2067_v42, %s1711_s14 }
 0x19a   :  { %535 = vrot.lane.b32.xlu1 %v2045_v38, %s1712_s17 }
 0x19b   :  { %v2120_v44 = vpop.permute.xlu2 %673 }
 0x1a1   :  { %475 = vrot.lane.b32.xlu0 %v2045_v38, %s1714_s18 }
 0x1a2   :  { %445 = vrot.lane.b32.xlu1 %v2045_v38, %s1715_s19 }
 0x1a3   :  { %v2122_v45 = vpop.permute.xlu2 %643 }
 0x1ab   :  { %v2139_v55 = vpop.permute.xlu2 %613 }
 0x1b3   :  { %v2161_v10 = vpop.permute.xlu2 %583 }
 0x1bb   :  { %v2185_v15 = vpop.permute.xlu2 %537 }
 0x1c3   :  { %v2131_v49 = vpop.permute.xlu0 %669  ;;  %v2211_v34 = vpop.permute.xlu2 %507 }
 0x1c4   :  { %v672_v50 = vpop.permute.xlu1 %671 }
 0x1c5   :  { %v678_v51 = vsel %vm286_vm0, %v672_v50, %v2120_v44  ;;  %v679_v52 = vsel %vm286_vm0, %v2131_v49, %v672_v50 }
 0x1c6   :  { %v691_v53 = vmul.f32 %v683_v47, %v679_v52  ;;  %v692_v54 = vmul.f32 %v684_v48, %v678_v51 }
 0x1c8   :  { %754 = vmatpush.msrb.mxu0 %v691_v53  ;;  %774 = vmatpush.msrb.mxu1 %v692_v54  ;;  %v2234_v53 = vld [vmem:[%s3215_s1 + $0x4] sm:$0xf] }
 0x1cb   :  { %v2148_v59 = vpop.permute.xlu0 %639  ;;  %v2236_v54 = vpop.permute.xlu2 %477 }
 0x1cc   :  { %v642_v60 = vpop.permute.xlu1 %641 }
 0x1cd   :  { %v648_v0 = vsel %vm254_vm2, %v642_v60, %v2122_v45  ;;  %v649_v62 = vsel %vm254_vm2, %v2148_v59, %v642_v60 }
 0x1ce   :  { %v661_v5 = vmul.f32 %v653_v58, %v649_v62  ;;  %v662_v8 = vmul.f32 %v654_v57, %v648_v0  ;;  %v485_v58 = vperm.slane %v2234_v53, 0  ;;  %v486_v57 = vperm.slane %v2234_v53, 1 }
 0x1d0   :  { %755 = vmatpush.msrb.mxu0 %v661_v5  ;;  %775 = vmatpush.msrb.mxu1 %v662_v8 }
 0x1d3   :  { %v2165_v13 = vpop.permute.xlu0 %609 }
 0x1d4   :  { %v612_v14 = vpop.permute.xlu1 %611 }
 0x1d5   :  { %v618_v17 = vsel %vm222_vm1, %v612_v14, %v2139_v55  ;;  %v619_v18 = vsel %vm222_vm1, %v2165_v13, %v612_v14  ;;  %v2253_v14 = vpop.permute.xlu2 %447 }
 0x1d6   :  { %v631_v19 = vmul.f32 %v623_v12, %v619_v18  ;;  %v632_v6 = vmul.f32 %v624_v63, %v618_v17  ;;  %v2251_v63 = vld [vmem:[%s3215_s1] sm:$0xf] }
 0x1d7   :  { %v455_v17 = vperm.slane %v2251_v63, 0  ;;  %v456_v18 = vperm.slane %v2251_v63, 1 }
 0x1d8   :  { %756 = vmatpush.msrb.mxu0 %v631_v19  ;;  %776 = vmatpush.msrb.mxu1 %v632_v6 }
 0x1db   :  { %v2187_v23 = vpop.permute.xlu0 %579 }
 0x1dc   :  { %v582_v24 = vpop.permute.xlu1 %581 }
 0x1dd   :  { %v588_v4 = vsel %vm190_vm3, %v582_v24, %v2161_v10  ;;  %v589_v26 = vsel %vm190_vm3, %v2187_v23, %v582_v24 }
 0x1de   :  { %v601_v29 = vmul.f32 %v593_v21, %v589_v26  ;;  %v602_v30 = vmul.f32 %v594_v22, %v588_v4  ;;  %v685_v4 = vperm.slane %v2127_v46, 2  ;;  %v686_v26 = vperm.slane %v2127_v46, 3 }
 0x1e0   :  { %757 = vmatpush.msrb.mxu0 %v601_v29  ;;  %777 = vmatpush.msrb.mxu1 %v602_v30  ;;  %v616_v29 = vpop.permute.xlu2 %615 }
 0x1e2   :  { %758 = vmatpush.msrb.mxu0 %v571_v32  ;;  %778 = vmatpush.msrb.mxu1 %v572_v35  ;;  %v655_v32 = vperm.slane %v2144_v56, 2  ;;  %v656_v35 = vperm.slane %v2144_v56, 3 }
 0x1e3   :  { %v532_v37 = vpop.permute.xlu0 %531 }
 0x1e4   :  { %v2206_v28 = vpop.permute.xlu1 %533  ;;  %v542_v39 = vsel %vm139_vm4, %v2185_v15, %v532_v37 }
 0x1e5   :  { %v541_v3 = vsel %vm139_vm4, %v532_v37, %v2206_v28  ;;  %v553_v1 = vmul.f32 %v545_v27, %v542_v39  ;;  %v625_v39 = vperm.slane %v2159_v9, 2 }
 0x1e6   :  { %v554_v2 = vmul.f32 %v546_v36, %v541_v3  ;;  %v626_v3 = vperm.slane %v2159_v9, 3 }
 0x1e7   :  { %759 = vmatpush.msrb.mxu0 %v553_v1 }
 0x1e8   :  { %779 = vmatpush.msrb.mxu1 %v554_v2 }
 0x1eb   :  { %v502_v43 = vpop.permute.xlu0 %501 }
 0x1ec   :  { %v2223_v47 = vpop.permute.xlu1 %503  ;;  %v512_v48 = vsel %vm107_vm5, %v2211_v34, %v502_v43 }
 0x1ed   :  { %v511_v50 = vsel %vm107_vm5, %v502_v43, %v2223_v47  ;;  %v523_v51 = vmul.f32 %v515_v40, %v512_v48  ;;  %v596_v43 = vperm.slane %v2176_v20, 3 }
 0x1ee   :  { %v524_v52 = vmul.f32 %v516_v41, %v511_v50  ;;  %v566_v50 = vperm.slane %v2181_v16, 3 }
 0x1ef   :  { %760 = vmatpush.msrb.mxu0 %v523_v51 }
 0x1f0   :  { %780 = vmatpush.msrb.mxu1 %v524_v52 }
 0x1f3   :  { %v472_v60 = vpop.permute.xlu0 %471 }
 0x1f4   :  { %v2240_v0 = vpop.permute.xlu1 %473  ;;  %v482_v62 = vsel %vm75_vm6, %v2236_v54, %v472_v60 }
 0x1f5   :  { %v481_v5 = vsel %vm75_vm6, %v472_v60, %v2240_v0  ;;  %v493_v8 = vmul.f32 %v485_v58, %v482_v62  ;;  %v506_v58 = vpop.permute.xlu2 %505  ;;  %v548_v62 = vperm.slane %v2200_v31, 3 }
 0x1f6   :  { %v494_v12 = vmul.f32 %v486_v57, %v481_v5 }
 0x1f7   :  { %761 = vmatpush.msrb.mxu0 %v493_v8  ;;  %v517_v8 = vperm.slane %v2219_v33, 2 }
 0x1f8   :  { %781 = vmatpush.msrb.mxu1 %v494_v12  ;;  %v518_v12 = vperm.slane %v2219_v33, 3 }
 0x1fb   :  { %v442_v19 = vpop.permute.xlu0 %441 }
 0x1fc   :  { %v2257_v6 = vpop.permute.xlu1 %443  ;;  %v452_v21 = vsel %vm44_vm7, %v2253_v14, %v442_v19 }
 0x1fd   :  { %v451_v22 = vsel %vm44_vm7, %v442_v19, %v2257_v6  ;;  %v463_v24 = vmul.f32 %v455_v17, %v452_v21  ;;  %v457_v21 = vperm.slane %v2251_v63, 2 }
 0x1fe   :  { %v464_v25 = vmul.f32 %v456_v18, %v451_v22 }
 0x1ff   :  { %762 = vmatpush.msrb.mxu0 %v463_v24  ;;  %v458_v24 = vperm.slane %v2251_v63, 3 }
 0x200   :  { %782 = vmatpush.msrb.mxu1 %v464_v25  ;;  %1645 = vmatmul.msk.f32.vlgmr.msrb.gmra.mxu0 %vm353_vm8, %v2268_v61 }
 0x201   :  { %1646 = vmatmul.msk.f32.vlgmr.msrb.gmra.mxu1 %vm353_vm8, %v2268_v61 }
 0x203   :  { %v676_v30 = vpop.permute.xlu0 %675 }
 0x204   :  { %v646_v27 = vpop.permute.xlu1 %645  ;;  %v677_v36 = vsel %vm286_vm0, %v2120_v44, %v676_v30  ;;  %v680_v37 = vsel %vm286_vm0, %v676_v30, %v2131_v49  ;;  %v617_v44 = vsel %vm222_vm1, %v2139_v55, %v616_v29  ;;  %v620_v49 = vsel %vm222_vm1, %v616_v29, %v2165_v13 }
 0x205   :  { %v647_v46 = vsel %vm254_vm2, %v2122_v45, %v646_v27  ;;  %v650_v56 = vsel %vm254_vm2, %v646_v27, %v2148_v59  ;;  %v693_v1 = vmul.f32 %v685_v4, %v677_v36  ;;  %v694_v2 = vmul.f32 %v686_v26, %v680_v37 }
 0x206   :  { %v663_v9 = vmul.f32 %v655_v32, %v647_v46  ;;  %v664_v40 = vmul.f32 %v656_v35, %v650_v56  ;;  %v633_v45 = vmul.f32 %v625_v39, %v617_v44  ;;  %v634_v41 = vmul.f32 %v626_v3, %v620_v49  ;;  %v966_v46 = vld [vmem:[%s3218_s4 + $0x78] sm:$0xff]  ;;  %v965_v49 = vld [vmem:[%s3218_s4 + $0x70] sm:$0xff] }
 0x207   :  { %794 = vmatpush.msrb.mxu2 %v693_v1  ;;  %814 = vmatpush.msrb.mxu3 %v694_v2  ;;  %v595_v59 = vperm.slane %v2176_v20, 2  ;;  %v565_v55 = vperm.slane %v2181_v16, 2  ;;  %v547_v20 = vperm.slane %v2200_v31, 2  ;;  %v509_v31 = vsel %vm107_vm5, %v506_v58, %v2211_v34  ;;  %v982_v56 = vld [vmem:[%s3218_s4 + $0xf8] sm:$0xff] }
 0x208   :  { %v526_v19 = vmul.f32 %v518_v12, %v509_v31  ;;  %v998_v1 = vld [vmem:[%s3218_s4 + $0x178] sm:$0xff]  ;;  %1252 = vmatpush.msra.mxu0 %v966_v46  ;;  %1272 = vmatpush.msra.mxu1 %v982_v56  ;;  %v960_v12 = vld [vmem:[%s3218_s4 + $0x48] sm:$0xff]  ;;  %v969_v46 = vld [vmem:[%s3218_s4 + $0x90] sm:$0xff] }
 0x209   :  { %795 = vmatpush.msrb.mxu2 %v663_v9  ;;  %815 = vmatpush.msrb.mxu3 %v664_v40  ;;  %v1014_v44 = vld [vmem:[%s3218_s4 + $0x1f8] sm:$0xff]  ;;  %v981_v9 = vld [vmem:[%s3218_s4 + $0xf0] sm:$0xff]  ;;  %v976_v31 = vld [vmem:[%s3218_s4 + $0xc8] sm:$0xff] }
 0x20a   :  { %1253 = vmatpush.msra.mxu0 %v965_v49  ;;  %1273 = vmatpush.msra.mxu1 %v981_v9  ;;  %v985_v56 = vld [vmem:[%s3218_s4 + $0x110] sm:$0xff]  ;;  %v984_v49 = vld [vmem:[%s3218_s4 + $0x108] sm:$0xff]  ;;  %v1142_v35 = vld [vmem:[%s3218_s4 + $0x5f8] sm:$0xff] }
 0x20b   :  { %796 = vmatpush.msrb.mxu2 %v633_v45  ;;  %816 = vmatpush.msrb.mxu3 %v634_v41  ;;  %v586_v48 = vpop.permute.xlu0 %585  ;;  %v997_v45 = vld [vmem:[%s3218_s4 + $0x170] sm:$0xff]  ;;  %v1000_v9 = vld [vmem:[%s3218_s4 + $0x188] sm:$0xff] }
 0x20c   :  { %v536_v13 = vpop.permute.xlu1 %535  ;;  %v587_v51 = vsel %vm190_vm3, %v2161_v10, %v586_v48  ;;  %v590_v52 = vsel %vm190_vm3, %v586_v48, %v2187_v23  ;;  %v573_v10 = vmul.f32 %v2045_v38, %v565_v55  ;;  %v574_v23 = vmul.f32 %v2067_v42, %v566_v50  ;;  %v1013_v41 = vld [vmem:[%s3218_s4 + $0x1f0] sm:$0xff]  ;;  %v996_v48 = vld [vmem:[%s3218_s4 + $0x168] sm:$0xff]  ;;  %v963_v50 = vld [vmem:[%s3218_s4 + $0x60] sm:$0xff] }
 0x20d   :  { %v603_v57 = vmul.f32 %v595_v59, %v587_v51  ;;  %v604_v60 = vmul.f32 %v596_v43, %v590_v52  ;;  %v539_v16 = vsel %vm139_vm4, %v536_v13, %v2185_v15  ;;  %v540_v5 = vsel %vm139_vm4, %v2206_v28, %v536_v13  ;;  %v964_v59 = vld [vmem:[%s3218_s4 + $0x68] sm:$0xff]  ;;  %v979_v13 = vld [vmem:[%s3218_s4 + $0xe0] sm:$0xff] }
 0x20e   :  { %v510_v15 = vsel %vm107_vm5, %v2223_v47, %v506_v58  ;;  %v555_v28 = vmul.f32 %v547_v20, %v540_v5  ;;  %v556_v17 = vmul.f32 %v548_v62, %v539_v16  ;;  %v487_v38 = vperm.slane %v2234_v53, 2  ;;  %v980_v43 = vld [vmem:[%s3218_s4 + $0xe8] sm:$0xff]  ;;  %1254 = vmatpush.msra.mxu0 %v964_v59  ;;  %v995_v51 = vld [vmem:[%s3218_s4 + $0x160] sm:$0xff]  ;;  %v962_v58 = vld [vmem:[%s3218_s4 + $0x58] sm:$0xff] }
 0x20f   :  { %797 = vmatpush.msrb.mxu2 %v603_v57  ;;  %817 = vmatpush.msrb.mxu3 %v604_v60  ;;  %v488_v42 = vperm.slane %v2234_v53, 3  ;;  %v525_v33 = vmul.f32 %v517_v8, %v510_v15  ;;  %v1012_v55 = vld [vmem:[%s3218_s4 + $0x1e8] sm:$0xff]  ;;  %v1011_v52 = vld [vmem:[%s3218_s4 + $0x1e0] sm:$0xff]  ;;  %v978_v57 = vld [vmem:[%s3218_s4 + $0xd8] sm:$0xff] }
 0x210   :  { %1274 = vmatpush.msra.mxu1 %v980_v43  ;;  %1255 = vmatpush.msra.mxu0 %v963_v50  ;;  %v994_v60 = vld [vmem:[%s3218_s4 + $0x158] sm:$0xff]  ;;  %v961_v16 = vld [vmem:[%s3218_s4 + $0x50] sm:$0xff]  ;;  %v983_v59 = vld [vmem:[%s3218_s4 + $0x100] sm:$0xff] }
 0x211   :  { %798 = vmatpush.msrb.mxu2 %v573_v10  ;;  %818 = vmatpush.msrb.mxu3 %v574_v23  ;;  %v1010_v20 = vld [vmem:[%s3218_s4 + $0x1d8] sm:$0xff]  ;;  %v977_v5 = vld [vmem:[%s3218_s4 + $0xd0] sm:$0xff]  ;;  %v999_v43 = vld [vmem:[%s3218_s4 + $0x180] sm:$0xff] }
 0x212   :  { %1275 = vmatpush.msra.mxu1 %v979_v13  ;;  %1256 = vmatpush.msra.mxu0 %v962_v58  ;;  %v993_v23 = vld [vmem:[%s3218_s4 + $0x150] sm:$0xff]  ;;  %v1062_v50 = vld [vmem:[%s3218_s4 + $0x378] sm:$0xff]  ;;  %v1028_v58 = vld [vmem:[%s3218_s4 + $0x268] sm:$0xff] }
 0x213   :  { %799 = vmatpush.msrb.mxu2 %v555_v28  ;;  %819 = vmatpush.msrb.mxu3 %v556_v17  ;;  %v476_v18 = vpop.permute.xlu0 %475  ;;  %v1009_v8 = vld [vmem:[%s3218_s4 + $0x1d0] sm:$0xff]  ;;  %v992_v17 = vld [vmem:[%s3218_s4 + $0x148] sm:$0xff] }
 0x214   :  { %v446_v34 = vpop.permute.xlu1 %445  ;;  %v479_v47 = vsel %vm75_vm6, %v476_v18, %v2236_v54  ;;  %v480_v22 = vsel %vm75_vm6, %v2240_v0, %v476_v18  ;;  %v742_v0 = vpop.permute.xlu2 %741  ;;  %1276 = vmatpush.msra.mxu1 %v978_v57  ;;  %1257 = vmatpush.msra.mxu0 %v961_v16  ;;  %v959_v18 = vld [vmem:[%s3218_s4 + $0x40] sm:$0xff]  ;;  %v1029_v13 = vld [vmem:[%s3218_s4 + $0x270] sm:$0xff]  ;;  %v1044_v57 = vld [vmem:[%s3218_s4 + $0x2e8] sm:$0xff] }
 0x215   :  { %v449_v53 = vsel %vm44_vm7, %v446_v34, %v2253_v14  ;;  %v450_v25 = vsel %vm44_vm7, %v2257_v6, %v446_v34  ;;  %800 = vmatpush.msrb.mxu2 %v525_v33  ;;  %820 = vmatpush.msrb.mxu3 %v526_v19  ;;  %v495_v4 = vmul.f32 %v487_v38, %v480_v22  ;;  %v1008_v38 = vld [vmem:[%s3218_s4 + $0x1c8] sm:$0xff]  ;;  %v975_v33 = vld [vmem:[%s3218_s4 + $0xc0] sm:$0xff]  ;;  %v958_v34 = vld [vmem:[%s3218_s4 + $0x38] sm:$0xff] }
 0x216   :  { %v496_v26 = vmul.f32 %v488_v42, %v479_v47  ;;  %v465_v54 = vmul.f32 %v457_v21, %v450_v25  ;;  %v466_v29 = vmul.f32 %v458_v24, %v449_v53  ;;  %1277 = vmatpush.msra.mxu1 %v977_v5  ;;  %1258 = vmatpush.msra.mxu0 %v960_v12  ;;  %v991_v19 = vld [vmem:[%s3218_s4 + $0x140] sm:$0xff]  ;;  %v974_v47 = vld [vmem:[%s3218_s4 + $0xb8] sm:$0xff]  ;;  %v957_v53 = vld [vmem:[%s3218_s4 + $0x30] sm:$0xff] }
 0x217   :  { %801 = vmatpush.msrb.mxu2 %v495_v4  ;;  %v1007_v21 = vld [vmem:[%s3218_s4 + $0x1c0] sm:$0xff]  ;;  %v990_v22 = vld [vmem:[%s3218_s4 + $0x138] sm:$0xff]  ;;  %v973_v25 = vld [vmem:[%s3218_s4 + $0xb0] sm:$0xff] }
 0x218   :  { %821 = vmatpush.msrb.mxu3 %v496_v26  ;;  %1278 = vmatpush.msra.mxu1 %v976_v31  ;;  %v1006_v24 = vld [vmem:[%s3218_s4 + $0x1b8] sm:$0xff]  ;;  %v989_v4 = vld [vmem:[%s3218_s4 + $0x130] sm:$0xff]  ;;  %v1027_v16 = vld [vmem:[%s3218_s4 + $0x260] sm:$0xff] }
 0x219   :  { %802 = vmatpush.msrb.mxu2 %v465_v54  ;;  %1259 = vmatpush.msra.mxu0 %v959_v18  ;;  %v1005_v26 = vld [vmem:[%s3218_s4 + $0x1b0] sm:$0xff]  ;;  %v956_v54 = vld [vmem:[%s3218_s4 + $0x28] sm:$0xff]  ;;  %v1043_v5 = vld [vmem:[%s3218_s4 + $0x2e0] sm:$0xff] }
 0x21a   :  { %822 = vmatpush.msrb.mxu3 %v466_v29  ;;  %1647 = vmatmul.msk.f32.vlgmr.msrb.gmra.mxu2 %vm353_vm8, %v2268_v61  ;;  %v972_v29 = vld [vmem:[%s3218_s4 + $0xa8] sm:$0xff]  ;;  %v1042_v12 = vld [vmem:[%s3218_s4 + $0x2d8] sm:$0xff]  ;;  %v1073_v18 = vld [vmem:[%s3218_s4 + $0x3d0] sm:$0xff] }
 0x21b   :  { %1648 = vmatmul.msk.f32.vlgmr.msrb.gmra.mxu3 %vm353_vm8, %v2268_v61  ;;  %1292 = vmatpush.msra.mxu2 %v998_v1  ;;  %v1001_v1 = vld [vmem:[%s3218_s4 + $0x190] sm:$0xff]  ;;  %v1058_v31 = vld [vmem:[%s3218_s4 + $0x358] sm:$0xff] }
 0x21c   :  { %1312 = vmatpush.msra.mxu3 %v1014_v44  ;;  %1279 = vmatpush.msra.mxu1 %v975_v33  ;;  %v968_v44 = vld [vmem:[%s3218_s4 + $0x88] sm:$0xff] }
 0x21d   :  { %1293 = vmatpush.msra.mxu2 %v997_v45  ;;  %1260 = vmatpush.msra.mxu0 %v958_v34  ;;  %v967_v45 = vld [vmem:[%s3218_s4 + $0x80] sm:$0xff]  ;;  %v1024_v33 = vld [vmem:[%s3218_s4 + $0x248] sm:$0xff] }
 0x21e   :  { %1313 = vmatpush.msra.mxu3 %v1013_v41  ;;  %1280 = vmatpush.msra.mxu1 %v974_v47  ;;  %v1072_v34 = vld [vmem:[%s3218_s4 + $0x3c8] sm:$0xff]  ;;  %v1023_v47 = vld [vmem:[%s3218_s4 + $0x240] sm:$0xff] }
 0x21f   :  { %1294 = vmatpush.msra.mxu2 %v996_v48  ;;  %1261 = vmatpush.msra.mxu0 %v957_v53  ;;  %v1030_v48 = vld [vmem:[%s3218_s4 + $0x278] sm:$0xff]  ;;  %v1055_v53 = vld [vmem:[%s3218_s4 + $0x340] sm:$0xff] }
 0x220   :  { %1314 = vmatpush.msra.mxu3 %v1012_v55  ;;  %1281 = vmatpush.msra.mxu1 %v973_v25  ;;  %v1046_v55 = vld [vmem:[%s3218_s4 + $0x2f8] sm:$0xff]  ;;  %v1071_v25 = vld [vmem:[%s3218_s4 + $0x3c0] sm:$0xff] }
 0x221   :  { %1295 = vmatpush.msra.mxu2 %v995_v51  ;;  %1262 = vmatpush.msra.mxu0 %v956_v54  ;;  %v1045_v51 = vld [vmem:[%s3218_s4 + $0x2f0] sm:$0xff]  ;;  %v1054_v54 = vld [vmem:[%s3218_s4 + $0x338] sm:$0xff] }
 0x222   :  { %1315 = vmatpush.msra.mxu3 %v1011_v52  ;;  %1282 = vmatpush.msra.mxu1 %v972_v29  ;;  %v1061_v52 = vld [vmem:[%s3218_s4 + $0x370] sm:$0xff]  ;;  %v1070_v29 = vld [vmem:[%s3218_s4 + $0x3b8] sm:$0xff] }
 0x223   :  { %1296 = vmatpush.msra.mxu2 %v994_v60  ;;  %v1060_v60 = vld [vmem:[%s3218_s4 + $0x368] sm:$0xff] }
 0x224   :  { %1316 = vmatpush.msra.mxu3 %v1010_v20  ;;  %v1076_v20 = vld [vmem:[%s3218_s4 + $0x3e8] sm:$0xff] }
 0x225   :  { %1297 = vmatpush.msra.mxu2 %v993_v23  ;;  %v1075_v23 = vld [vmem:[%s3218_s4 + $0x3e0] sm:$0xff] }
 0x226   :  { %1317 = vmatpush.msra.mxu3 %v1009_v8  ;;  %v1026_v8 = vld [vmem:[%s3218_s4 + $0x258] sm:$0xff] }
 0x227   :  { %1298 = vmatpush.msra.mxu2 %v992_v17  ;;  %v1025_v17 = vld [vmem:[%s3218_s4 + $0x250] sm:$0xff] }
 0x228   :  { %1318 = vmatpush.msra.mxu3 %v1008_v38  ;;  %v1041_v38 = vld [vmem:[%s3218_s4 + $0x2d0] sm:$0xff] }
 0x229   :  { %1299 = vmatpush.msra.mxu2 %v991_v19  ;;  %v1040_v19 = vld [vmem:[%s3218_s4 + $0x2c8] sm:$0xff] }
 0x22a   :  { %1319 = vmatpush.msra.mxu3 %v1007_v21  ;;  %v1056_v21 = vld [vmem:[%s3218_s4 + $0x348] sm:$0xff] }
 0x22b   :  { %1300 = vmatpush.msra.mxu2 %v990_v22  ;;  %v1039_v22 = vld [vmem:[%s3218_s4 + $0x2c0] sm:$0xff] }
 0x22c   :  { %1320 = vmatpush.msra.mxu3 %v1006_v24 }
 0x22d   :  { %1301 = vmatpush.msra.mxu2 %v989_v4  ;;  %v1022_v4 = vld [vmem:[%s3218_s4 + $0x238] sm:$0xff] }
 0x22e   :  { %1321 = vmatpush.msra.mxu3 %v1005_v26  ;;  %v1038_v26 = vld [vmem:[%s3218_s4 + $0x2b8] sm:$0xff] }
 0x27d   :  { %v764_v63 = vpop.f32.mrf.mxu0 }
 0x27e   :  { %v765_v11 = vadd.f32 %v764_v63, %v742_v0  ;;  %v784_v14 = vpop.f32.mrf.mxu1  ;;  %v1004_v63 = vld [vmem:[%s3218_s4 + $0x1a8] sm:$0xff] }
 0x27f   :  { %v785_v6 = vadd.f32 %v784_v14, %v742_v0  ;;  %v955_v14 = vld [vmem:[%s3218_s4 + $0x20] sm:$0xff]  ;;  %1322 = vmatpush.msra.mxu3 %v1004_v63  ;;  %v1037_v63 = vld [vmem:[%s3218_s4 + $0x2b0] sm:$0xff] }
 0x280   :  { %1672 = vtanh.f32 %v765_v11  ;;  %1263 = vmatpush.msra.mxu0 %v955_v14  ;;  %v1069_v14 = vld [vmem:[%s3218_s4 + $0x3b0] sm:$0xff] }
 0x281   :  { %1674 = vtanh.f32 %v785_v6  ;;  %v971_v6 = vld [vmem:[%s3218_s4 + $0xa0] sm:$0xff] }
 0x282   :  { %1283 = vmatpush.msra.mxu1 %v971_v6  ;;  %v1020_v6 = vld [vmem:[%s3218_s4 + $0x228] sm:$0xff] }
 0x286   :  { %v2346_v30 = vpop.eup %1672 }
 0x287   :  { %v2348_v32 = vpop.eup %1674  ;;  %842 = vst [vmem:[#allocation1] sm:$0xff] %v2346_v30 }
 0x288   :  { %v833_v61 = vrot.slane %v2348_v32, 7  ;;  %843 = vst [vmem:[#allocation1 + $0x9] sm:$0xff] %v2348_v32 }
 0x28a   :  { %v835_v27 = vsel %vm834_vm9, %v2346_v30, %v833_v61  ;;  %v987_v61 = vld [vmem:[%s3218_s4 + $0x120] sm:$0xff] }
 0x28b   :  { %841 = vst.msk [vmem:[#allocation3] ss:$2 sm:$0x3] %vm2352_vm10, %v835_v27  ;;  %v1003_v27 = vld [vmem:[%s3218_s4 + $0x1a0] sm:$0xff] }
 0x28c   :  { %1323 = vmatpush.msra.mxu3 %v1003_v27  ;;  %v1052_v27 = vld [vmem:[%s3218_s4 + $0x328] sm:$0xff] }
 0x28f   :  { %v845_v36 = vld [vmem:[#allocation1 + $0x1] ss:$9 sm:$0xff] }
 0x290   :  { %849 = vst [vmem:[#allocation1] sm:$0xff] %v2346_v30 }
 0x291   :  { %850 = vst [vmem:[#allocation1 + $0x9] sm:$0xff] %v2348_v32 }
 0x292   :  { %848 = vst.msk [vmem:[#allocation3 + $0x4] ss:$2 sm:$0x3] %vm2352_vm10, %v845_v36  ;;  %v954_v36 = vld [vmem:[%s3218_s4 + $0x18] sm:$0xff] }
 0x293   :  { %1264 = vmatpush.msra.mxu0 %v954_v36  ;;  %v1068_v36 = vld [vmem:[%s3218_s4 + $0x3a8] sm:$0xff] }
 0x298   :  { %v852_v7 = vld [vmem:[#allocation1 + $0x2] ss:$9 sm:$0xff] }
 0x299   :  { %856 = vst [vmem:[#allocation1] sm:$0xff] %v2346_v30 }
 0x29a   :  { %857 = vst [vmem:[#allocation1 + $0x9] sm:$0xff] %v2348_v32 }
 0x29b   :  { %855 = vst.msk [vmem:[#allocation3 + $0x8] ss:$2 sm:$0x3] %vm2352_vm10, %v852_v7  ;;  %v970_v7 = vld [vmem:[%s3218_s4 + $0x98] sm:$0xff] }
 0x29c   :  { %1284 = vmatpush.msra.mxu1 %v970_v7  ;;  %v1019_v7 = vld [vmem:[%s3218_s4 + $0x220] sm:$0xff] }
 0x29d   :  { %v804_v37 = vpop.f32.mrf.mxu2 }
 0x29e   :  { %v824_v39 = vpop.f32.mrf.mxu3  ;;  %v805_v2 = vadd.f32 %v804_v37, %v742_v0  ;;  %v986_v37 = vld [vmem:[%s3218_s4 + $0x118] sm:$0xff]  ;;  %1285 = vmatpush.msra.mxu1 %v969_v46 }
 0x29f   :  { %v825_v3 = vadd.f32 %v824_v39, %v742_v0  ;;  %v988_v0 = vld [vmem:[%s3218_s4 + $0x128] sm:$0xff]  ;;  %v1002_v39 = vld [vmem:[%s3218_s4 + $0x198] sm:$0xff] }
 0x2a0   :  { %1302 = vmatpush.msra.mxu2 %v988_v0  ;;  %1324 = vmatpush.msra.mxu3 %v1002_v39  ;;  %v1021_v0 = vld [vmem:[%s3218_s4 + $0x230] sm:$0xff]  ;;  %v1051_v39 = vld [vmem:[%s3218_s4 + $0x320] sm:$0xff]  ;;  %v1018_v46 = vld [vmem:[%s3218_s4 + $0x218] sm:$0xff] }
 0x2a1   :  { %v859_v40 = vld [vmem:[#allocation1 + $0x3] ss:$9 sm:$0xff]  ;;  %1676 = vtanh.f32 %v825_v3  ;;  %1286 = vmatpush.msra.mxu1 %v968_v44 }
 0x2a2   :  { %863 = vst [vmem:[#allocation1] sm:$0xff] %v2346_v30  ;;  %1678 = vtanh.f32 %v805_v2  ;;  %1303 = vmatpush.msra.mxu2 %v987_v61  ;;  %v953_v3 = vld [vmem:[%s3218_s4 + $0x10] sm:$0xff]  ;;  %v952_v2 = vld [vmem:[%s3218_s4 + $0x8] sm:$0xff]  ;;  %1325 = vmatpush.msra.mxu3 %v1001_v1  ;;  %v1066_v44 = vld [vmem:[%s3218_s4 + $0x398] sm:$0xff] }
 0x2a3   :  { %864 = vst [vmem:[#allocation1 + $0x9] sm:$0xff] %v2348_v32  ;;  %1265 = vmatpush.msra.mxu0 %v953_v3  ;;  %1287 = vmatpush.msra.mxu1 %v967_v45  ;;  %v1036_v61 = vld [vmem:[%s3218_s4 + $0x2a8] sm:$0xff]  ;;  %v1067_v3 = vld [vmem:[%s3218_s4 + $0x3a0] sm:$0xff]  ;;  %v1065_v45 = vld [vmem:[%s3218_s4 + $0x390] sm:$0xff] }
 0x2a4   :  { %862 = vst.msk [vmem:[#allocation3 + $0xc] ss:$2 sm:$0x3] %vm2352_vm10, %v859_v40  ;;  %1304 = vmatpush.msra.mxu2 %v986_v37  ;;  %v951_v40 = vld [vmem:[%s3218_s4] sm:$0xff]  ;;  %1326 = vmatpush.msra.mxu3 %v1000_v9  ;;  %v1033_v9 = vld [vmem:[%s3218_s4 + $0x290] sm:$0xff] }
 0x2a5   :  { %1266 = vmatpush.msra.mxu0 %v952_v2  ;;  %1352 = vmatpush.msrb.mxu1 %v1046_v55  ;;  %v1035_v37 = vld [vmem:[%s3218_s4 + $0x2a0] sm:$0xff]  ;;  %v1050_v2 = vld [vmem:[%s3218_s4 + $0x318] sm:$0xff] }
 0x2a6   :  { %1305 = vmatpush.msra.mxu2 %v985_v56  ;;  %1327 = vmatpush.msra.mxu3 %v999_v43  ;;  %v1034_v56 = vld [vmem:[%s3218_s4 + $0x298] sm:$0xff]  ;;  %v1048_v43 = vld [vmem:[%s3218_s4 + $0x308] sm:$0xff]  ;;  %v1015_v55 = vld [vmem:[%s3218_s4 + $0x200] sm:$0xff] }
 0x2a7   :  { %v2434_v62 = vpop.eup %1676  ;;  %1267 = vmatpush.msra.mxu0 %v951_v40  ;;  %1353 = vmatpush.msrb.mxu1 %v1045_v51  ;;  %v1049_v40 = vld [vmem:[%s3218_s4 + $0x310] sm:$0xff] }
 0x2a8   :  { %v893_v10 = vrot.slane %v2434_v62, 7  ;;  %v2455_v15 = vpop.eup %1678  ;;  %1306 = vmatpush.msra.mxu2 %v984_v49  ;;  %v1017_v49 = vld [vmem:[%s3218_s4 + $0x210] sm:$0xff] }
 0x2a9   :  { %1332 = vmatpush.msrb.mxu0 %v1030_v48  ;;  %1354 = vmatpush.msrb.mxu1 %v1044_v57  ;;  %v1064_v48 = vld [vmem:[%s3218_s4 + $0x388] sm:$0xff] }
 0x2aa   :  { %v866_v28 = vld [vmem:[#allocation1 + $0x4] ss:$9 sm:$0xff]  ;;  %v894_v42 = vsel %vm834_vm9, %v2455_v15, %v893_v10  ;;  %1307 = vmatpush.msra.mxu2 %v983_v59 }
 0x2ab   :  { %870 = vst [vmem:[#allocation1] sm:$0xff] %v2346_v30  ;;  %1333 = vmatpush.msrb.mxu0 %v1029_v13  ;;  %v1059_v10 = vld [vmem:[%s3218_s4 + $0x360] sm:$0xff]  ;;  %1355 = vmatpush.msrb.mxu1 %v1043_v5  ;;  %v1032_v59 = vld [vmem:[%s3218_s4 + $0x288] sm:$0xff]  ;;  %v1094_v5 = vld [vmem:[%s3218_s4 + $0x478] sm:$0xff] }
 0x2ac   :  { %871 = vst [vmem:[#allocation1 + $0x9] sm:$0xff] %v2348_v32  ;;  %1372 = vmatpush.msrb.mxu2 %v1062_v50  ;;  %v1031_v50 = vld [vmem:[%s3218_s4 + $0x280] sm:$0xff] }
 0x2ad   :  { %869 = vst.msk [vmem:[#allocation3 + $0x10] ss:$2 sm:$0x3] %vm2352_vm10, %v866_v28  ;;  %1334 = vmatpush.msrb.mxu0 %v1028_v58  ;;  %v1074_v28 = vld [vmem:[%s3218_s4 + $0x3d8] sm:$0xff]  ;;  %1356 = vmatpush.msrb.mxu1 %v1042_v12  ;;  %v1063_v13 = vld [vmem:[%s3218_s4 + $0x380] sm:$0xff]  ;;  %v1093_v12 = vld [vmem:[%s3218_s4 + $0x470] sm:$0xff] }
 0x2ae   :  { %897 = vst.msk [vmem:[#allocation3 + $0x1] ss:$2 sm:$0x3] %vm2352_vm10, %v894_v42  ;;  %1373 = vmatpush.msrb.mxu2 %v1061_v52  ;;  %v1057_v42 = vld [vmem:[%s3218_s4 + $0x350] sm:$0xff] }
 0x2af   :  { %1335 = vmatpush.msrb.mxu0 %v1027_v16  ;;  %1357 = vmatpush.msrb.mxu1 %v1041_v38  ;;  %v1125_v38 = vld [vmem:[%s3218_s4 + $0x570] sm:$0xff] }
 0x2b0   :  { %1374 = vmatpush.msrb.mxu2 %v1060_v60 }
 0x2b1   :  { %1336 = vmatpush.msrb.mxu0 %v1026_v8  ;;  %1358 = vmatpush.msrb.mxu1 %v1040_v19 }
 0x2b2   :  { %1375 = vmatpush.msrb.mxu2 %v1059_v10  ;;  %v1110_v10 = vld [vmem:[%s3218_s4 + $0x4f8] sm:$0xff] }
 0x2b3   :  { %v873_v11 = vld [vmem:[#allocation1 + $0x5] ss:$9 sm:$0xff]  ;;  %1337 = vmatpush.msrb.mxu0 %v1025_v17  ;;  %1359 = vmatpush.msrb.mxu1 %v1039_v22 }
 0x2b4   :  { %877 = vst [vmem:[#allocation1] sm:$0xff] %v2346_v30  ;;  %1376 = vmatpush.msrb.mxu2 %v1058_v31  ;;  %v1109_v31 = vld [vmem:[%s3218_s4 + $0x4f0] sm:$0xff] }
 0x2b5   :  { %878 = vst [vmem:[#allocation1 + $0x9] sm:$0xff] %v2348_v32  ;;  %1338 = vmatpush.msrb.mxu0 %v1024_v33  ;;  %1360 = vmatpush.msrb.mxu1 %v1038_v26  ;;  %v1123_v26 = vld [vmem:[%s3218_s4 + $0x560] sm:$0xff] }
 0x2b6   :  { %876 = vst.msk [vmem:[#allocation3 + $0x14] ss:$2 sm:$0x3] %vm2352_vm10, %v873_v11  ;;  %1377 = vmatpush.msrb.mxu2 %v1057_v42  ;;  %v1053_v11 = vld [vmem:[%s3218_s4 + $0x330] sm:$0xff] }
 0x2b7   :  { %1339 = vmatpush.msrb.mxu0 %v1023_v47  ;;  %1361 = vmatpush.msrb.mxu1 %v1037_v63  ;;  %v1141_v42 = vld [vmem:[%s3218_s4 + $0x5f0] sm:$0xff]  ;;  %v1108_v47 = vld [vmem:[%s3218_s4 + $0x4e8] sm:$0xff]  ;;  %v1122_v63 = vld [vmem:[%s3218_s4 + $0x558] sm:$0xff] }
 0x2b8   :  { %1378 = vmatpush.msrb.mxu2 %v1056_v21 }
 0x2b9   :  { %1340 = vmatpush.msrb.mxu0 %v1022_v4  ;;  %1362 = vmatpush.msrb.mxu1 %v1036_v61  ;;  %v1107_v4 = vld [vmem:[%s3218_s4 + $0x4e0] sm:$0xff]  ;;  %v1121_v61 = vld [vmem:[%s3218_s4 + $0x550] sm:$0xff] }
 0x2ba   :  { %1379 = vmatpush.msrb.mxu2 %v1055_v53  ;;  %v1140_v53 = vld [vmem:[%s3218_s4 + $0x5e8] sm:$0xff] }
 0x2bb   :  { %1341 = vmatpush.msrb.mxu0 %v1021_v0  ;;  %1363 = vmatpush.msrb.mxu1 %v1035_v37  ;;  %v1106_v0 = vld [vmem:[%s3218_s4 + $0x4d8] sm:$0xff]  ;;  %v1120_v37 = vld [vmem:[%s3218_s4 + $0x548] sm:$0xff] }
 0x2bc   :  { %v880_v41 = vld [vmem:[#allocation1 + $0x6] ss:$9 sm:$0xff]  ;;  %1380 = vmatpush.msrb.mxu2 %v1054_v54 }
 0x2bd   :  { %885 = vst [vmem:[#allocation1 + $0x9] sm:$0xff] %v2348_v32  ;;  %v1078_v32 = vld [vmem:[%s3218_s4 + $0x3f8] sm:$0xff]  ;;  %1342 = vmatpush.msrb.mxu0 %v1020_v6  ;;  %1364 = vmatpush.msrb.mxu1 %v1034_v56  ;;  %v1139_v54 = vld [vmem:[%s3218_s4 + $0x5e0] sm:$0xff]  ;;  %v1105_v6 = vld [vmem:[%s3218_s4 + $0x4d0] sm:$0xff] }
 0x2be   :  { %883 = vst.msk [vmem:[#allocation3 + $0x18] ss:$2 sm:$0x3] %vm2352_vm10, %v880_v41  ;;  %1392 = vmatpush.msrb.mxu3 %v1078_v32  ;;  %1381 = vmatpush.msrb.mxu2 %v1053_v11  ;;  %v1016_v41 = vld [vmem:[%s3218_s4 + $0x208] sm:$0xff]  ;;  %v1047_v32 = vld [vmem:[%s3218_s4 + $0x300] sm:$0xff]  ;;  %v1138_v11 = vld [vmem:[%s3218_s4 + $0x5d8] sm:$0xff] }
 0x2bf   :  { %884 = vst [vmem:[#allocation1] sm:$0xff] %v2346_v30  ;;  %v1077_v30 = vld [vmem:[%s3218_s4 + $0x3f0] sm:$0xff]  ;;  %1343 = vmatpush.msrb.mxu0 %v1019_v7  ;;  %1365 = vmatpush.msrb.mxu1 %v1033_v9  ;;  %v1104_v7 = vld [vmem:[%s3218_s4 + $0x4c8] sm:$0xff]  ;;  %v1119_v56 = vld [vmem:[%s3218_s4 + $0x540] sm:$0xff] }
 0x2c0   :  { %1393 = vmatpush.msrb.mxu3 %v1077_v30  ;;  %1382 = vmatpush.msrb.mxu2 %v1052_v27  ;;  %v1137_v27 = vld [vmem:[%s3218_s4 + $0x5d0] sm:$0xff]  ;;  %v1134_v9 = vld [vmem:[%s3218_s4 + $0x5b8] sm:$0xff] }
 0x2c1   :  { %1344 = vmatpush.msrb.mxu0 %v1018_v46  ;;  %1366 = vmatpush.msrb.mxu1 %v1032_v59  ;;  %v1103_v46 = vld [vmem:[%s3218_s4 + $0x4c0] sm:$0xff]  ;;  %v1133_v59 = vld [vmem:[%s3218_s4 + $0x5b0] sm:$0xff] }
 0x2c2   :  { %1394 = vmatpush.msrb.mxu3 %v1076_v20  ;;  %1383 = vmatpush.msrb.mxu2 %v1051_v39  ;;  %v1136_v39 = vld [vmem:[%s3218_s4 + $0x5c8] sm:$0xff] }
 0x2c3   :  { %1345 = vmatpush.msrb.mxu0 %v1017_v49  ;;  %1367 = vmatpush.msrb.mxu1 %v1031_v50  ;;  %v1118_v49 = vld [vmem:[%s3218_s4 + $0x538] sm:$0xff]  ;;  %v1132_v50 = vld [vmem:[%s3218_s4 + $0x5a8] sm:$0xff] }
 0x2c4   :  { %1395 = vmatpush.msrb.mxu3 %v1075_v23  ;;  %1384 = vmatpush.msrb.mxu2 %v1050_v2  ;;  %v1086_v2 = vld [vmem:[%s3218_s4 + $0x438] sm:$0xff] }
 0x2c5   :  { %1346 = vmatpush.msrb.mxu0 %v1016_v41  ;;  %v1117_v41 = vld [vmem:[%s3218_s4 + $0x530] sm:$0xff] }
 0x2c6   :  { %1396 = vmatpush.msrb.mxu3 %v1074_v28  ;;  %v887_v24 = vld [vmem:[#allocation1 + $0x7] ss:$9 sm:$0xff]  ;;  %1385 = vmatpush.msrb.mxu2 %v1049_v40 }
 0x2c7   :  { %890 = vst.msk [vmem:[#allocation3 + $0x1c] ss:$2 sm:$0x3] %vm2352_vm10, %v887_v24  ;;  %1347 = vmatpush.msrb.mxu0 %v1015_v55  ;;  %v1124_v24 = vld [vmem:[%s3218_s4 + $0x568] sm:$0xff]  ;;  %v1085_v40 = vld [vmem:[%s3218_s4 + $0x430] sm:$0xff] }
 0x2c8   :  { %1397 = vmatpush.msrb.mxu3 %v1073_v18  ;;  %898 = vst [vmem:[#allocation1] sm:$0xff] %v2455_v15  ;;  %1386 = vmatpush.msrb.mxu2 %v1048_v43  ;;  %v1084_v43 = vld [vmem:[%s3218_s4 + $0x428] sm:$0xff] }
 0x2c9   :  { %899 = vst [vmem:[#allocation1 + $0x9] sm:$0xff] %v2434_v62  ;;  %v1116_v55 = vld [vmem:[%s3218_s4 + $0x528] sm:$0xff] }
 0x2ca   :  { %1398 = vmatpush.msrb.mxu3 %v1072_v34  ;;  %1387 = vmatpush.msrb.mxu2 %v1047_v32  ;;  %v1092_v34 = vld [vmem:[%s3218_s4 + $0x468] sm:$0xff]  ;;  %v1083_v32 = vld [vmem:[%s3218_s4 + $0x420] sm:$0xff] }
 0x2cc   :  { %1399 = vmatpush.msrb.mxu3 %v1071_v25  ;;  %v1091_v25 = vld [vmem:[%s3218_s4 + $0x460] sm:$0xff] }
 0x2ce   :  { %1400 = vmatpush.msrb.mxu3 %v1070_v29  ;;  %v1090_v29 = vld [vmem:[%s3218_s4 + $0x458] sm:$0xff] }
 0x2d0   :  { %1401 = vmatpush.msrb.mxu3 %v1069_v14  ;;  %v901_v1 = vld [vmem:[#allocation1 + $0x1] ss:$9 sm:$0xff] }
 0x2d1   :  { %904 = vst.msk [vmem:[#allocation3 + $0x5] ss:$2 sm:$0x3] %vm2352_vm10, %v901_v1  ;;  %v1089_v14 = vld [vmem:[%s3218_s4 + $0x450] sm:$0xff]  ;;  %v1135_v1 = vld [vmem:[%s3218_s4 + $0x5c0] sm:$0xff] }
 0x2d2   :  { %1402 = vmatpush.msrb.mxu3 %v1068_v36  ;;  %905 = vst [vmem:[#allocation1] sm:$0xff] %v2455_v15  ;;  %v1088_v36 = vld [vmem:[%s3218_s4 + $0x448] sm:$0xff] }
 0x2d3   :  { %906 = vst [vmem:[#allocation1 + $0x9] sm:$0xff] %v2434_v62 }
 0x2d4   :  { %1403 = vmatpush.msrb.mxu3 %v1067_v3  ;;  %v1087_v3 = vld [vmem:[%s3218_s4 + $0x440] sm:$0xff] }
 0x2d6   :  { %1404 = vmatpush.msrb.mxu3 %v1066_v44  ;;  %v1102_v44 = vld [vmem:[%s3218_s4 + $0x4b8] sm:$0xff] }
 0x2d8   :  { %1405 = vmatpush.msrb.mxu3 %v1065_v45  ;;  %v947_v20 = vld [vmem:[#allocation3] sm:$0xff]  ;;  %v1101_v45 = vld [vmem:[%s3218_s4 + $0x4b0] sm:$0xff] }
 0x2da   :  { %1406 = vmatpush.msrb.mxu3 %v1064_v48  ;;  %v908_v51 = vld [vmem:[#allocation1 + $0x2] ss:$9 sm:$0xff] }
 0x2db   :  { %912 = vst [vmem:[#allocation1] sm:$0xff] %v2455_v15  ;;  %v1100_v48 = vld [vmem:[%s3218_s4 + $0x4a8] sm:$0xff] }
 0x2dc   :  { %1407 = vmatpush.msrb.mxu3 %v1063_v13  ;;  %913 = vst [vmem:[#allocation1 + $0x9] sm:$0xff] %v2434_v62  ;;  %v1099_v13 = vld [vmem:[%s3218_s4 + $0x4a0] sm:$0xff] }
 0x2dd   :  { %911 = vst.msk [vmem:[#allocation3 + $0x9] ss:$2 sm:$0x3] %vm2352_vm10, %v908_v51  ;;  %v1115_v51 = vld [vmem:[%s3218_s4 + $0x520] sm:$0xff] }
 0x2e3   :  { %v915_v52 = vld [vmem:[#allocation1 + $0x3] ss:$9 sm:$0xff] }
 0x2e4   :  { %919 = vst [vmem:[#allocation1] sm:$0xff] %v2455_v15 }
 0x2e5   :  { %920 = vst [vmem:[#allocation1 + $0x9] sm:$0xff] %v2434_v62 }
 0x2e6   :  { %918 = vst.msk [vmem:[#allocation3 + $0xd] ss:$2 sm:$0x3] %vm2352_vm10, %v915_v52  ;;  %v1131_v52 = vld [vmem:[%s3218_s4 + $0x5a0] sm:$0xff] }
 0x2ec   :  { %v922_v30 = vld [vmem:[#allocation1 + $0x4] ss:$9 sm:$0xff] }
 0x2ed   :  { %925 = vst.msk [vmem:[#allocation3 + $0x11] ss:$2 sm:$0x3] %vm2352_vm10, %v922_v30  ;;  %v948_v16 = vld [vmem:[#allocation3 + $0x8] sm:$0xff]  ;;  %v1082_v30 = vld [vmem:[%s3218_s4 + $0x418] sm:$0xff] }
 0x2ee   :  { %926 = vst [vmem:[#allocation1] sm:$0xff] %v2455_v15 }
 0x2ef   :  { %927 = vst [vmem:[#allocation1 + $0x9] sm:$0xff] %v2434_v62 }
 0x2f6   :  { %v929_v58 = vld [vmem:[#allocation1 + $0x5] ss:$9 sm:$0xff] }
 0x2f7   :  { %932 = vst.msk [vmem:[#allocation3 + $0x15] ss:$2 sm:$0x3] %vm2352_vm10, %v929_v58  ;;  %v1098_v58 = vld [vmem:[%s3218_s4 + $0x498] sm:$0xff] }
 0x2f8   :  { %933 = vst [vmem:[#allocation1] sm:$0xff] %v2455_v15 }
 0x2f9   :  { %934 = vst [vmem:[#allocation1 + $0x9] sm:$0xff] %v2434_v62 }
 0x2fe   :  { %v949_v22 = vld [vmem:[#allocation3 + $0x10] sm:$0xff] }
 0x300   :  { %v936_v57 = vld [vmem:[#allocation1 + $0x6] ss:$9 sm:$0xff] }
 0x301   :  { %939 = vst.msk [vmem:[#allocation3 + $0x19] ss:$2 sm:$0x3] %vm2352_vm10, %v936_v57  ;;  %v1114_v57 = vld [vmem:[%s3218_s4 + $0x518] sm:$0xff] }
 0x302   :  { %940 = vst [vmem:[#allocation1] sm:$0xff] %v2455_v15 }
 0x303   :  { %941 = vst [vmem:[#allocation1 + $0x9] sm:$0xff] %v2434_v62  ;;  %v1126_v62 = vld [vmem:[%s3218_s4 + $0x578] sm:$0xff] }
 0x30a   :  { %v943_v60 = vld [vmem:[#allocation1 + $0x7] ss:$9 sm:$0xff] }
 0x30b   :  { %946 = vst.msk [vmem:[#allocation3 + $0x1d] ss:$2 sm:$0x3] %vm2352_vm10, %v943_v60  ;;  %v1130_v60 = vld [vmem:[%s3218_s4 + $0x598] sm:$0xff] }
 0x30c   :  { %1215 = vst [vmem:[#allocation1] ss:$4 sm:$0xff] %v947_v20  ;;  %v1081_v20 = vld [vmem:[%s3218_s4 + $0x410] sm:$0xff] }
 0x30d   :  { %1217 = vst [vmem:[#allocation1 + $0x20] ss:$4 sm:$0xff] %v948_v16  ;;  %v1097_v16 = vld [vmem:[%s3218_s4 + $0x490] sm:$0xff] }
 0x312   :  { %v950_v23 = vld [vmem:[#allocation3 + $0x18] sm:$0xff] }
 0x313   :  { %v1218_v15 = vld.sshfl [vmem:[#allocation1] sm:$0xff pattern:$0x73625140]  ;;  %v1219_v8 = vld.sshfl [vmem:[#allocation1 + $0x8] sm:$0xff pattern:$0x73625140] }
 0x314   :  { %1268 = vmatmul.f32.vlgmr.msra.gmra.mxu0 %v1218_v15  ;;  %1288 = vmatmul.f32.vlgmr.msra.gmra.mxu1 %v1219_v8  ;;  %v1220_v28 = vld.sshfl [vmem:[#allocation1 + $0x10] sm:$0xff pattern:$0x73625140]  ;;  %v1221_v17 = vld.sshfl [vmem:[#allocation1 + $0x18] sm:$0xff pattern:$0x73625140] }
 0x315   :  { %1308 = vmatmul.f32.vlgmr.msra.gmra.mxu2 %v1220_v28  ;;  %1328 = vmatmul.f32.vlgmr.msra.gmra.mxu3 %v1221_v17  ;;  %v1222_v18 = vld.sshfl [vmem:[#allocation1 + $0x20] sm:$0xff pattern:$0x73625140]  ;;  %v1223_v33 = vld.sshfl [vmem:[#allocation1 + $0x28] sm:$0xff pattern:$0x73625140] }
 0x316   :  { %1412 = vmatpush.msra.mxu0 %v1094_v5  ;;  %1432 = vmatpush.msra.mxu1 %v1110_v10  ;;  %v1224_v19 = vld.sshfl [vmem:[#allocation1 + $0x30] sm:$0xff pattern:$0x73625140]  ;;  %v1225_v21 = vld.sshfl [vmem:[#allocation1 + $0x38] sm:$0xff pattern:$0x73625140] }
 0x317   :  { %1452 = vmatpush.msra.mxu2 %v1126_v62  ;;  %1472 = vmatpush.msra.mxu3 %v1142_v35  ;;  %1227 = vst [vmem:[#allocation1 + $0x20] ss:$4 sm:$0xff] %v950_v23  ;;  %v1113_v5 = vld [vmem:[%s3218_s4 + $0x510] sm:$0xff]  ;;  %v1080_v23 = vld [vmem:[%s3218_s4 + $0x408] sm:$0xff]  ;;  %v1079_v8 = vld [vmem:[%s3218_s4 + $0x400] sm:$0xff] }
 0x318   :  { %1413 = vmatpush.msra.mxu0 %v1093_v12  ;;  %1433 = vmatpush.msra.mxu1 %v1109_v31  ;;  %1226 = vst [vmem:[#allocation1] ss:$4 sm:$0xff] %v949_v22  ;;  %v1129_v10 = vld [vmem:[%s3218_s4 + $0x590] sm:$0xff]  ;;  %v1096_v62 = vld [vmem:[%s3218_s4 + $0x488] sm:$0xff]  ;;  %v1095_v12 = vld [vmem:[%s3218_s4 + $0x480] sm:$0xff] }
 0x319   :  { %1453 = vmatpush.msra.mxu2 %v1125_v38  ;;  %1473 = vmatpush.msra.mxu3 %v1141_v42  ;;  %v1112_v35 = vld [vmem:[%s3218_s4 + $0x508] sm:$0xff]  ;;  %v1111_v31 = vld [vmem:[%s3218_s4 + $0x500] sm:$0xff]  ;;  %v1158_v17 = vld [vmem:[%s3218_s4 + $0x678] sm:$0xff] }
 0x31a   :  { %1414 = vmatpush.msra.mxu0 %v1092_v34  ;;  %1434 = vmatpush.msra.mxu1 %v1108_v47  ;;  %v1128_v15 = vld [vmem:[%s3218_s4 + $0x588] sm:$0xff]  ;;  %v1127_v28 = vld [vmem:[%s3218_s4 + $0x580] sm:$0xff]  ;;  %v1174_v38 = vld [vmem:[%s3218_s4 + $0x6f8] sm:$0xff] }
 0x31b   :  { %1454 = vmatpush.msra.mxu2 %v1124_v24  ;;  %1474 = vmatpush.msra.mxu3 %v1140_v53  ;;  %v1190_v42 = vld [vmem:[%s3218_s4 + $0x778] sm:$0xff]  ;;  %v1157_v47 = vld [vmem:[%s3218_s4 + $0x670] sm:$0xff] }
 0x31c   :  { %1415 = vmatpush.msra.mxu0 %v1091_v25  ;;  %1435 = vmatpush.msra.mxu1 %v1107_v4  ;;  %v1173_v22 = vld [vmem:[%s3218_s4 + $0x6f0] sm:$0xff]  ;;  %v1156_v25 = vld [vmem:[%s3218_s4 + $0x668] sm:$0xff] }
 0x31d   :  { %1455 = vmatpush.msra.mxu2 %v1123_v26  ;;  %1475 = vmatpush.msra.mxu3 %v1139_v54  ;;  %v1189_v24 = vld [vmem:[%s3218_s4 + $0x770] sm:$0xff]  ;;  %v1172_v4 = vld [vmem:[%s3218_s4 + $0x6e8] sm:$0xff] }
 0x31e   :  { %1348 = vmatmul.f32.vlgmr.msrb.gmra.mxu0 %v1222_v18  ;;  %1368 = vmatmul.f32.vlgmr.msrb.gmra.mxu1 %v1223_v33  ;;  %v1206_v18 = vld [vmem:[%s3218_s4 + $0x7f8] sm:$0xff]  ;;  %v1205_v53 = vld [vmem:[%s3218_s4 + $0x7f0] sm:$0xff]  ;;  %v1188_v26 = vld [vmem:[%s3218_s4 + $0x768] sm:$0xff] }
 0x31f   :  { %1388 = vmatmul.f32.vlgmr.msrb.gmra.mxu2 %v1224_v19  ;;  %1408 = vmatmul.f32.vlgmr.msrb.gmra.mxu3 %v1225_v21  ;;  %v1228_v33 = vld.sshfl [vmem:[#allocation1] sm:$0xff pattern:$0x73625140]  ;;  %v1229_v19 = vld.sshfl [vmem:[#allocation1 + $0x8] sm:$0xff pattern:$0x73625140] }
 0x320   :  { %1416 = vmatpush.msra.mxu0 %v1090_v29  ;;  %1436 = vmatpush.msra.mxu1 %v1106_v0  ;;  %v1230_v21 = vld.sshfl [vmem:[#allocation1 + $0x10] sm:$0xff pattern:$0x73625140]  ;;  %v1231_v34 = vld.sshfl [vmem:[#allocation1 + $0x18] sm:$0xff pattern:$0x73625140] }
 0x321   :  { %1456 = vmatpush.msra.mxu2 %v1122_v63  ;;  %1476 = vmatpush.msra.mxu3 %v1138_v11  ;;  %v1204_v54 = vld [vmem:[%s3218_s4 + $0x7e8] sm:$0xff]  ;;  %v1155_v29 = vld [vmem:[%s3218_s4 + $0x660] sm:$0xff] }
 0x322   :  { %1417 = vmatpush.msra.mxu0 %v1089_v14  ;;  %1437 = vmatpush.msra.mxu1 %v1105_v6  ;;  %v1171_v0 = vld [vmem:[%s3218_s4 + $0x6e0] sm:$0xff]  ;;  %v1154_v14 = vld [vmem:[%s3218_s4 + $0x658] sm:$0xff] }
 0x323   :  { %1457 = vmatpush.msra.mxu2 %v1121_v61  ;;  %1477 = vmatpush.msra.mxu3 %v1137_v27  ;;  %v1187_v63 = vld [vmem:[%s3218_s4 + $0x760] sm:$0xff]  ;;  %v1170_v6 = vld [vmem:[%s3218_s4 + $0x6d8] sm:$0xff] }
 0x324   :  { %1418 = vmatpush.msra.mxu0 %v1088_v36  ;;  %1438 = vmatpush.msra.mxu1 %v1104_v7  ;;  %v1203_v11 = vld [vmem:[%s3218_s4 + $0x7e0] sm:$0xff]  ;;  %v1186_v61 = vld [vmem:[%s3218_s4 + $0x758] sm:$0xff]  ;;  %v1153_v36 = vld [vmem:[%s3218_s4 + $0x650] sm:$0xff] }
 0x325   :  { %1458 = vmatpush.msra.mxu2 %v1120_v37  ;;  %1478 = vmatpush.msra.mxu3 %v1136_v39  ;;  %v1202_v27 = vld [vmem:[%s3218_s4 + $0x7d8] sm:$0xff]  ;;  %v1169_v7 = vld [vmem:[%s3218_s4 + $0x6d0] sm:$0xff] }
 0x326   :  { %1419 = vmatpush.msra.mxu0 %v1087_v3  ;;  %1439 = vmatpush.msra.mxu1 %v1103_v46  ;;  %v1185_v37 = vld [vmem:[%s3218_s4 + $0x750] sm:$0xff]  ;;  %v1152_v3 = vld [vmem:[%s3218_s4 + $0x648] sm:$0xff] }
 0x327   :  { %1459 = vmatpush.msra.mxu2 %v1119_v56  ;;  %1479 = vmatpush.msra.mxu3 %v1135_v1  ;;  %v1201_v39 = vld [vmem:[%s3218_s4 + $0x7d0] sm:$0xff]  ;;  %v1168_v46 = vld [vmem:[%s3218_s4 + $0x6c8] sm:$0xff] }
 0x328   :  { %1420 = vmatpush.msra.mxu0 %v1086_v2  ;;  %1440 = vmatpush.msra.mxu1 %v1102_v44  ;;  %v1184_v56 = vld [vmem:[%s3218_s4 + $0x748] sm:$0xff]  ;;  %v1151_v2 = vld [vmem:[%s3218_s4 + $0x640] sm:$0xff] }
 0x329   :  { %1460 = vmatpush.msra.mxu2 %v1118_v49  ;;  %1480 = vmatpush.msra.mxu3 %v1134_v9  ;;  %v1200_v1 = vld [vmem:[%s3218_s4 + $0x7c8] sm:$0xff]  ;;  %v1167_v44 = vld [vmem:[%s3218_s4 + $0x6c0] sm:$0xff] }
 0x32a   :  { %1421 = vmatpush.msra.mxu0 %v1085_v40  ;;  %1441 = vmatpush.msra.mxu1 %v1101_v45  ;;  %v1183_v49 = vld [vmem:[%s3218_s4 + $0x740] sm:$0xff]  ;;  %v1150_v40 = vld [vmem:[%s3218_s4 + $0x638] sm:$0xff] }
 0x32b   :  { %1461 = vmatpush.msra.mxu2 %v1117_v41  ;;  %1481 = vmatpush.msra.mxu3 %v1133_v59  ;;  %v1199_v9 = vld [vmem:[%s3218_s4 + $0x7c0] sm:$0xff]  ;;  %v1166_v45 = vld [vmem:[%s3218_s4 + $0x6b8] sm:$0xff] }
 0x32c   :  { %1422 = vmatpush.msra.mxu0 %v1084_v43  ;;  %1442 = vmatpush.msra.mxu1 %v1100_v48  ;;  %v1182_v41 = vld [vmem:[%s3218_s4 + $0x738] sm:$0xff]  ;;  %v1149_v43 = vld [vmem:[%s3218_s4 + $0x630] sm:$0xff] }
 0x32d   :  { %1462 = vmatpush.msra.mxu2 %v1116_v55  ;;  %1482 = vmatpush.msra.mxu3 %v1132_v50  ;;  %v1198_v59 = vld [vmem:[%s3218_s4 + $0x7b8] sm:$0xff]  ;;  %v1165_v48 = vld [vmem:[%s3218_s4 + $0x6b0] sm:$0xff] }
 0x32e   :  { %1423 = vmatpush.msra.mxu0 %v1083_v32  ;;  %1443 = vmatpush.msra.mxu1 %v1099_v13  ;;  %v1181_v55 = vld [vmem:[%s3218_s4 + $0x730] sm:$0xff]  ;;  %v1148_v32 = vld [vmem:[%s3218_s4 + $0x628] sm:$0xff] }
 0x32f   :  { %1463 = vmatpush.msra.mxu2 %v1115_v51  ;;  %1483 = vmatpush.msra.mxu3 %v1131_v52  ;;  %v1197_v50 = vld [vmem:[%s3218_s4 + $0x7b0] sm:$0xff]  ;;  %v1164_v13 = vld [vmem:[%s3218_s4 + $0x6a8] sm:$0xff] }
 0x330   :  { %1424 = vmatpush.msra.mxu0 %v1082_v30  ;;  %1444 = vmatpush.msra.mxu1 %v1098_v58  ;;  %v1180_v51 = vld [vmem:[%s3218_s4 + $0x728] sm:$0xff]  ;;  %v1147_v30 = vld [vmem:[%s3218_s4 + $0x620] sm:$0xff] }
 0x331   :  { %1464 = vmatpush.msra.mxu2 %v1114_v57  ;;  %1484 = vmatpush.msra.mxu3 %v1130_v60  ;;  %v1196_v52 = vld [vmem:[%s3218_s4 + $0x7a8] sm:$0xff]  ;;  %v1163_v58 = vld [vmem:[%s3218_s4 + $0x6a0] sm:$0xff] }
 0x332   :  { %1425 = vmatpush.msra.mxu0 %v1081_v20  ;;  %1445 = vmatpush.msra.mxu1 %v1097_v16  ;;  %v1179_v57 = vld [vmem:[%s3218_s4 + $0x720] sm:$0xff]  ;;  %v1146_v20 = vld [vmem:[%s3218_s4 + $0x618] sm:$0xff] }
 0x333   :  { %1465 = vmatpush.msra.mxu2 %v1113_v5  ;;  %1485 = vmatpush.msra.mxu3 %v1129_v10  ;;  %v1195_v60 = vld [vmem:[%s3218_s4 + $0x7a0] sm:$0xff]  ;;  %v1162_v16 = vld [vmem:[%s3218_s4 + $0x698] sm:$0xff] }
 0x334   :  { %1426 = vmatpush.msra.mxu0 %v1080_v23  ;;  %1446 = vmatpush.msra.mxu1 %v1096_v62  ;;  %v1178_v5 = vld [vmem:[%s3218_s4 + $0x718] sm:$0xff]  ;;  %v1145_v23 = vld [vmem:[%s3218_s4 + $0x610] sm:$0xff] }
 0x335   :  { %1466 = vmatpush.msra.mxu2 %v1112_v35  ;;  %1486 = vmatpush.msra.mxu3 %v1128_v15  ;;  %v1194_v10 = vld [vmem:[%s3218_s4 + $0x798] sm:$0xff]  ;;  %v1161_v62 = vld [vmem:[%s3218_s4 + $0x690] sm:$0xff] }
 0x336   :  { %1427 = vmatpush.msra.mxu0 %v1079_v8  ;;  %1447 = vmatpush.msra.mxu1 %v1095_v12  ;;  %v1177_v35 = vld [vmem:[%s3218_s4 + $0x710] sm:$0xff]  ;;  %v1144_v8 = vld [vmem:[%s3218_s4 + $0x608] sm:$0xff] }
 0x337   :  { %1467 = vmatpush.msra.mxu2 %v1111_v31  ;;  %1487 = vmatpush.msra.mxu3 %v1127_v28  ;;  %v1193_v15 = vld [vmem:[%s3218_s4 + $0x790] sm:$0xff]  ;;  %v1160_v12 = vld [vmem:[%s3218_s4 + $0x688] sm:$0xff] }
 0x338   :  { %1428 = vmatmul.f32.vlgmr.msra.gmra.mxu0 %v1228_v33  ;;  %1448 = vmatmul.f32.vlgmr.msra.gmra.mxu1 %v1229_v19  ;;  %v1176_v31 = vld [vmem:[%s3218_s4 + $0x708] sm:$0xff]  ;;  %v1232_v33 = vld.sshfl [vmem:[#allocation1 + $0x20] sm:$0xff pattern:$0x73625140] }
 0x339   :  { %1468 = vmatmul.f32.vlgmr.msra.gmra.mxu2 %v1230_v21  ;;  %1488 = vmatmul.f32.vlgmr.msra.gmra.mxu3 %v1231_v34  ;;  %v1192_v28 = vld [vmem:[%s3218_s4 + $0x788] sm:$0xff]  ;;  %v1234_v21 = vld.sshfl [vmem:[#allocation1 + $0x30] sm:$0xff pattern:$0x73625140] }
 0x33a   :  { %1492 = vmatpush.msrb.mxu0 %v1158_v17  ;;  %1512 = vmatpush.msrb.mxu1 %v1174_v38  ;;  %v1143_v17 = vld [vmem:[%s3218_s4 + $0x600] sm:$0xff]  ;;  %v1233_v19 = vld.sshfl [vmem:[#allocation1 + $0x28] sm:$0xff pattern:$0x73625140] }
 0x33b   :  { %1532 = vmatpush.msrb.mxu2 %v1190_v42  ;;  %1552 = vmatpush.msrb.mxu3 %v1206_v18  ;;  %v1159_v38 = vld [vmem:[%s3218_s4 + $0x680] sm:$0xff]  ;;  %v1235_v34 = vld.sshfl [vmem:[#allocation1 + $0x38] sm:$0xff pattern:$0x73625140] }
 0x33c   :  { %1493 = vmatpush.msrb.mxu0 %v1157_v47  ;;  %1513 = vmatpush.msrb.mxu1 %v1173_v22  ;;  %v1175_v42 = vld [vmem:[%s3218_s4 + $0x700] sm:$0xff] }
 0x33d   :  { %1533 = vmatpush.msrb.mxu2 %v1189_v24  ;;  %1553 = vmatpush.msrb.mxu3 %v1205_v53  ;;  %v1191_v18 = vld [vmem:[%s3218_s4 + $0x780] sm:$0xff] }
 0x33e   :  { %1494 = vmatpush.msrb.mxu0 %v1156_v25  ;;  %1514 = vmatpush.msrb.mxu1 %v1172_v4  ;;  %v1662_v47 = vld [vmem:[%s3219_s5] ss:$0 sm:$0xff] }
 0x33f   :  { %1534 = vmatpush.msrb.mxu2 %v1188_v26  ;;  %1554 = vmatpush.msrb.mxu3 %v1204_v54 }
 0x340   :  { %1495 = vmatpush.msrb.mxu0 %v1155_v29  ;;  %1515 = vmatpush.msrb.mxu1 %v1171_v0 }
 0x341   :  { %1535 = vmatpush.msrb.mxu2 %v1187_v63  ;;  %1555 = vmatpush.msrb.mxu3 %v1203_v11 }
 0x342   :  { %1496 = vmatpush.msrb.mxu0 %v1154_v14  ;;  %1516 = vmatpush.msrb.mxu1 %v1170_v6  ;;  %v1576_v6 = vld [vmem:[%s3220_s6 + $0x18] sm:$0xff] }
 0x343   :  { %1536 = vmatpush.msrb.mxu2 %v1186_v61  ;;  %1556 = vmatpush.msrb.mxu3 %v1202_v27  ;;  %v1575_v61 = vld [vmem:[%s3220_s6 + $0x10] sm:$0xff] }
 0x344   :  { %1497 = vmatpush.msrb.mxu0 %v1153_v36  ;;  %1517 = vmatpush.msrb.mxu1 %v1169_v7  ;;  %v1574_v36 = vld [vmem:[%s3220_s6 + $0x8] sm:$0xff] }
 0x345   :  { %1537 = vmatpush.msrb.mxu2 %v1185_v37  ;;  %1557 = vmatpush.msrb.mxu3 %v1201_v39  ;;  %v1573_v37 = vld [vmem:[%s3220_s6] sm:$0xff] }
 0x346   :  { %1498 = vmatpush.msrb.mxu0 %v1152_v3  ;;  %1518 = vmatpush.msrb.mxu1 %v1168_v46 }
 0x347   :  { %1538 = vmatpush.msrb.mxu2 %v1184_v56  ;;  %1558 = vmatpush.msrb.mxu3 %v1200_v1 }
 0x348   :  { %1499 = vmatpush.msrb.mxu0 %v1151_v2  ;;  %1519 = vmatpush.msrb.mxu1 %v1167_v44 }
 0x349   :  { %1539 = vmatpush.msrb.mxu2 %v1183_v49  ;;  %1559 = vmatpush.msrb.mxu3 %v1199_v9 }
 0x34a   :  { %1500 = vmatpush.msrb.mxu0 %v1150_v40  ;;  %1520 = vmatpush.msrb.mxu1 %v1166_v45 }
 0x34b   :  { %1540 = vmatpush.msrb.mxu2 %v1182_v41  ;;  %1560 = vmatpush.msrb.mxu3 %v1198_v59 }
 0x34c   :  { %1501 = vmatpush.msrb.mxu0 %v1149_v43  ;;  %1521 = vmatpush.msrb.mxu1 %v1165_v48 }
 0x34d   :  { %1541 = vmatpush.msrb.mxu2 %v1181_v55  ;;  %1561 = vmatpush.msrb.mxu3 %v1197_v50 }
 0x34e   :  { %1502 = vmatpush.msrb.mxu0 %v1148_v32  ;;  %1522 = vmatpush.msrb.mxu1 %v1164_v13 }
 0x34f   :  { %1542 = vmatpush.msrb.mxu2 %v1180_v51  ;;  %1562 = vmatpush.msrb.mxu3 %v1196_v52  ;;  %v1663_v51 = vld [vmem:[%s3221_s7] ss:$0 sm:$0xff] }
 0x350   :  { %1503 = vmatpush.msrb.mxu0 %v1147_v30  ;;  %1523 = vmatpush.msrb.mxu1 %v1163_v58 }
 0x351   :  { %1543 = vmatpush.msrb.mxu2 %v1179_v57  ;;  %1563 = vmatpush.msrb.mxu3 %v1195_v60 }
 0x352   :  { %1504 = vmatpush.msrb.mxu0 %v1146_v20  ;;  %1524 = vmatpush.msrb.mxu1 %v1162_v16 }
 0x353   :  { %1544 = vmatpush.msrb.mxu2 %v1178_v5  ;;  %1564 = vmatpush.msrb.mxu3 %v1194_v10 }
 0x354   :  { %1505 = vmatpush.msrb.mxu0 %v1145_v23  ;;  %1525 = vmatpush.msrb.mxu1 %v1161_v62 }
 0x355   :  { %1545 = vmatpush.msrb.mxu2 %v1177_v35  ;;  %1565 = vmatpush.msrb.mxu3 %v1193_v15 }
 0x356   :  { %1506 = vmatpush.msrb.mxu0 %v1144_v8  ;;  %1526 = vmatpush.msrb.mxu1 %v1160_v12 }
 0x357   :  { %1546 = vmatpush.msrb.mxu2 %v1176_v31  ;;  %1566 = vmatpush.msrb.mxu3 %v1192_v28 }
 0x358   :  { %1507 = vmatpush.msrb.mxu0 %v1143_v17  ;;  %1527 = vmatpush.msrb.mxu1 %v1159_v38 }
 0x359   :  { %1547 = vmatpush.msrb.mxu2 %v1175_v42  ;;  %1567 = vmatpush.msrb.mxu3 %v1191_v18 }
 0x35a   :  { %1508 = vmatmul.f32.vlgmr.msrb.gmra.mxu0 %v1232_v33  ;;  %1528 = vmatmul.f32.vlgmr.msrb.gmra.mxu1 %v1233_v19 }
 0x35b   :  { %1548 = vmatmul.f32.vlgmr.msrb.gmra.mxu2 %v1234_v21  ;;  %1568 = vmatmul.f32.vlgmr.msrb.gmra.mxu3 %v1235_v34 }
 0x35c   :  { %1597 = vmatpush.msra.mxu0 %v1576_v6 }
 0x35e   :  { %1598 = vmatpush.msra.mxu0 %v1575_v61 }
 0x360   :  { %1599 = vmatpush.msra.mxu0 %v1574_v36 }
 0x362   :  { %1600 = vmatpush.msra.mxu0 %v1573_v37 }
 0x391   :  { %v1269_v22 = vpop.f32.mrf.mxu0  ;;  %v1289_v53 = vpop.f32.mrf.mxu1 }
 0x392   :  { %v1270_v24 = vadd.f32 %v1662_v47, %v1269_v22 }
 0x394   :  { %v1290_v4 = vadd.f32 %v1289_v53, %v1270_v24 }
 0x398   :  { %v1309_v25 = vpop.f32.mrf.mxu2  ;;  %v1329_v54 = vpop.f32.mrf.mxu3 }
 0x399   :  { %v1310_v26 = vadd.f32 %v1309_v25, %v1290_v4 }
 0x39b   :  { %v1330_v29 = vadd.f32 %v1329_v54, %v1310_v26  ;;  %v1349_v0 = vpop.f32.mrf.mxu0  ;;  %v1369_v11 = vpop.f32.mrf.mxu1 }
 0x39d   :  { %v1350_v63 = vadd.f32 %v1349_v0, %v1330_v29 }
 0x39f   :  { %v1370_v14 = vadd.f32 %v1369_v11, %v1350_v63 }
 0x3a2   :  { %v1389_v27 = vpop.f32.mrf.mxu2  ;;  %v1409_v39 = vpop.f32.mrf.mxu3 }
 0x3a3   :  { %v1390_v7 = vadd.f32 %v1389_v27, %v1370_v14 }
 0x3a5   :  { %v1410_v46 = vadd.f32 %v1409_v39, %v1390_v7 }
 0x3b5   :  { %v1429_v3 = vpop.f32.mrf.mxu0  ;;  %v1449_v1 = vpop.f32.mrf.mxu1 }
 0x3b6   :  { %v1430_v56 = vadd.f32 %v1429_v3, %v1410_v46 }
 0x3b8   :  { %v1450_v44 = vadd.f32 %v1449_v1, %v1430_v56 }
 0x3bc   :  { %v1469_v2 = vpop.f32.mrf.mxu2  ;;  %v1489_v9 = vpop.f32.mrf.mxu3 }
 0x3bd   :  { %v1470_v49 = vadd.f32 %v1469_v2, %v1450_v44 }
 0x3bf   :  { %v1490_v40 = vadd.f32 %v1489_v9, %v1470_v49 }
 0x3d7   :  { %v1509_v45 = vpop.f32.mrf.mxu0  ;;  %v1529_v59 = vpop.f32.mrf.mxu1 }
 0x3d8   :  { %v1510_v41 = vadd.f32 %v1509_v45, %v1490_v40 }
 0x3da   :  { %v1530_v43 = vadd.f32 %v1529_v59, %v1510_v41 }
 0x3de   :  { %v1549_v48 = vpop.f32.mrf.mxu2  ;;  %v1569_v50 = vpop.f32.mrf.mxu3 }
 0x3df   :  { %v1550_v55 = vadd.f32 %v1549_v48, %v1530_v43 }
 0x3e1   :  { %v1570_v32 = vadd.f32 %v1569_v50, %v1550_v55 }
 0x3e3   :  { %1680 = vtanh.f32 %v1570_v32 }
 0x3e9   :  { %v1681_v13 = vpop.eup %1680 }
 0x3ea   :  { %1649 = vmatmul.msk.f32.vlgmr.msra.gmra.mxu0 %vm1581_vm11, %v1681_v13 }
 0x467   :  { %v1602_v52 = vpop.f32.mrf.mxu0 }
 0x468   :  { %v1603_v30 = vadd.f32 %v1663_v51, %v1602_v52 }
 0x46a   :  { %1606 = vst.msk [vmem:[#allocation4] sm:$0x3] %vm1605_vm12, %v1603_v30 }
 0x46b   :  { %1617 = dma.vmem_to_hbm [thread:$0]  %s1613_s25, 32, %s1615_s28, [#allocation5]  }
 0x46c   :  { %1706 = dma.done.wait [#allocation5], 32  }
 0x46d   :  { %1707 = vsyncadd [#allocation5], 4294967264 }
 0x46e   :  { %1622 = vsyncpa [#allocation5], 1 }

</bundles_post_ra>
